<compile_context>
chip_gen: v6e
topology: v6e:2x2x1
jax: 0.10.0
libtpu: 0.0.40
codegen_flags: <defaults>
</compile_context>

<pallas_src>
import functools
import math

import jax
import jax.numpy as jnp
from jax import lax
from jax.experimental import pallas as pl
from jax.experimental.pallas import tpu as pltpu


# ----------------------------------------------------------------------------
# Pallas kernel: RBF-ARD kernel matrices + fused augmented Gauss-Jordan solve +
# GP predictive mean/variance + NLL.  One GP task per grid step.
# ----------------------------------------------------------------------------
def _gp_kernel(scal_ref, ls_ref, zt_ref, zs_ref, y_ref, pv_ref, loss_ref):
    f32 = jnp.float32
    N, D = zt_ref.shape
    M = zs_ref.shape[0]

    b = pl.program_id(0)
    variance = scal_ref[b, 0]            # scalar reads from SMEM (scalar prefetch)
    noise = scal_ref[b, 1]
    jitter = scal_ref[b, 2]

    ls = ls_ref[...]                     # (1, D) ARD lengthscale
    Zt = zt_ref[...] / ls                # (N, D) scaled train inputs
    Zs = zs_ref[...] / ls                # (M, D) scaled test inputs
    y = y_ref[...]                       # (1, N)

    zt2 = Zt * Zt
    zs2 = Zs * Zs
    dn_last = (((1,), (1,)), ((), ()))   # contract last dims
    ones_d = jnp.ones((1, D), dtype=f32)

    # Column squared norms via a lane reduce (XLU); the (1,N)/(1,M) row forms
    # via a tiny dot against ones (kept: an (N,1)->(1,N) transpose is a riskier
    # lowering than an MXU push that is otherwise idle here).
    tt_col = jnp.sum(zt2, axis=1, keepdims=True)                                 # (N, 1)
    tt_row = lax.dot_general(ones_d, zt2, dn_last, preferred_element_type=f32)   # (1, N)
    ss_row = lax.dot_general(ones_d, zs2, dn_last, preferred_element_type=f32)   # (1, M)
    cross_ff = lax.dot_general(Zt, Zt, dn_last, preferred_element_type=f32)      # (N, N)
    cross_fs = lax.dot_general(Zt, Zs, dn_last, preferred_element_type=f32)      # (N, M)

    r2_ff = jnp.maximum(tt_col + tt_row - 2.0 * cross_ff, 0.0)
    r2_fs = jnp.maximum(tt_col + ss_row - 2.0 * cross_fs, 0.0)

    row_i = lax.broadcasted_iota(jnp.int32, (N, N), 0)
    col_i = lax.broadcasted_iota(jnp.int32, (N, N), 1)
    eye = (row_i == col_i).astype(f32)

    Kff = variance * jnp.exp(-0.5 * r2_ff) + (noise + jitter) * eye              # (N, N)
    Kfs = variance * jnp.exp(-0.5 * r2_fs)                                       # (N, M)

    # Fused Gauss-Jordan on the vertically augmented matrix [Kff; I] (2N, N)
    # using COLUMN operations: after N pivots the bottom block is Kff^{-1}
    # (Kff * E = I  =>  E = Kff^{-1}, and I * E = E sits in the bottom block).
    # One reciprocal + one rank-1 update + one select per pivot; log|Kff|
    # accumulates from the (positive, SPD) pivots.
    # TODO(synk): for N beyond a few hundred this unrolled O(N) loop should be
    # replaced by a blocked Cholesky (MXU rank-k updates, fori_loop).
    Aug = jnp.concatenate([Kff, eye], axis=0)                # (2N, N), sublane concat
    cid = lax.broadcasted_iota(jnp.int32, (1, N), 1)         # (1, N) column ids
    logdet = jnp.zeros((1, 1), dtype=f32)
    for k in range(N):
        pivot = Aug[k:k + 1, k:k + 1]                        # (1, 1)
        logdet = logdet + jnp.log(pivot)
        inv_p = 1.0 / pivot
        pcol = Aug[:, k:k + 1] * inv_p                       # (2N, 1) scaled pivot col
        rowf = jnp.where(cid == k, 0.0, Aug[k:k + 1, :])     # (1, N), pivot entry zeroed
        Aug = jnp.where(cid == k, pcol, Aug - pcol * rowf)
    Inv = Aug[N:2 * N, :]                                    # (N, N) = Kff^{-1}

    dn_mm = (((1,), (0,)), ((), ()))
    alpha = lax.dot_general(y, Inv, dn_mm, preferred_element_type=f32)           # (1, N)
    pred = lax.dot_general(alpha, Kfs, dn_mm, preferred_element_type=f32)        # (1, M)
    W = lax.dot_general(Inv, Kfs, dn_mm, preferred_element_type=f32)             # (N, M)
    qdiag = jnp.sum(W * Kfs, axis=0, keepdims=True)                              # (1, M)
    var_y = jnp.maximum(variance + noise - qdiag, 0.0)                           # (1, M)

    quad = jnp.sum(alpha * y, axis=1, keepdims=True)                             # (1, 1)
    nll = 0.5 * quad + 0.5 * logdet + (0.5 * N * math.log(2.0 * math.pi))

    pv_ref[0:1, :] = pred
    pv_ref[1:2, :] = var_y
    loss_ref[...] = nll


def gp_predict_pallas_batched(train_Z, train_y, test_Z, lengthscale,
                              variance, noise, jitter):
    """Batched GP predict + NLL on TPU with ONE pallas_call.

    Shapes: train_Z (B,N,D), train_y (B,N), test_Z (B,M,D), lengthscale (B,D);
    variance / noise / jitter are scalars or (B,).
    Returns (pred (B,M), var (B,M), loss (B,)).
    """
    f32 = jnp.float32
    train_Z = jnp.asarray(train_Z, f32)
    test_Z = jnp.asarray(test_Z, f32)
    B, N, D = train_Z.shape
    M = test_Z.shape[1]

    def as_b(x):
        return jnp.broadcast_to(jnp.asarray(x, f32).reshape(-1), (B,))

    scal = jnp.stack([as_b(variance), as_b(noise), as_b(jitter),
                      jnp.zeros((B,), f32)], axis=1)                 # (B, 4) -> SMEM
    ls3 = jnp.asarray(lengthscale, f32).reshape(B, 1, D)
    y3 = jnp.asarray(train_y, f32).reshape(B, 1, N)

    grid_spec = pltpu.PrefetchScalarGridSpec(
        num_scalar_prefetch=1,                                       # scal -> SMEM
        grid=(B,),
        in_specs=[
            pl.BlockSpec((None, 1, D), lambda b, scal: (b, 0, 0)),   # lengthscale
            pl.BlockSpec((None, N, D), lambda b, scal: (b, 0, 0)),   # train_Z
            pl.BlockSpec((None, M, D), lambda b, scal: (b, 0, 0)),   # test_Z
            pl.BlockSpec((None, 1, N), lambda b, scal: (b, 0, 0)),   # train_y
        ],
        out_specs=[
            pl.BlockSpec((None, 2, M), lambda b, scal: (b, 0, 0)),   # [pred; var]
            pl.BlockSpec((None, 1, 1), lambda b, scal: (b, 0, 0)),   # nll
        ],
    )
    pv, loss = pl.pallas_call(
        _gp_kernel,
        out_shape=(jax.ShapeDtypeStruct((B, 2, M), f32),
                   jax.ShapeDtypeStruct((B, 1, 1), f32)),
        grid_spec=grid_spec,
        compiler_params=pltpu.CompilerParams(
            dimension_semantics=("parallel",)),
    )(scal, ls3, train_Z, test_Z, y3)
    return pv[:, 0, :], pv[:, 1, :], loss[:, 0, 0]


def gp_predict_pallas(train_Z, train_y, test_Z, lengthscale, variance, noise, jitter):
    """Single-task convenience wrapper: returns (pred (M,), var (M,), loss ())."""
    f32 = jnp.float32
    pred, var_y, loss = gp_predict_pallas_batched(
        jnp.asarray(train_Z, f32)[None],
        jnp.asarray(train_y, f32).reshape(1, -1),
        jnp.asarray(test_Z, f32)[None],
        jnp.asarray(lengthscale, f32).reshape(1, -1),
        variance, noise, jitter)
    return pred[0], var_y[0], loss[0]


# ----------------------------------------------------------------------------
# Plain-JAX GP NLL used ONLY to drive the Adam adaptation (needs autograd).
# ----------------------------------------------------------------------------
def _gp_nll_ref(theta, Z, y, noise, jitter):
    N, D = Z.shape
    ls = jnp.exp(theta[:D])
    var = jnp.exp(theta[D])
    Zs = Z / ls
    sq = jnp.sum(Zs * Zs, axis=1)
    r2 = jnp.maximum(sq[:, None] + sq[None, :] - 2.0 * Zs @ Zs.T, 0.0)
    K = var * jnp.exp(-0.5 * r2) + (noise + jitter) * jnp.eye(N, dtype=Z.dtype)
    alpha = jnp.linalg.solve(K, y)
    _, logdet = jnp.linalg.slogdet(K)
    return (0.5 * jnp.dot(y, alpha) + 0.5 * logdet
            + 0.5 * N * math.log(2.0 * math.pi))


def _adapt(theta0, Z, y, noise, jitter, lr, n_adapt):
    """n_adapt Adam steps on the GP NLL (lax.scan).  Returns (theta, last_loss),
    where last_loss is the NLL evaluated at the params *before* the final step
    (matches the `loss` returned by the PyTorch forward)."""
    vg = jax.value_and_grad(_gp_nll_ref)
    b1, b2, eps = 0.9, 0.999, 1e-8

    def step(carry, t):
        theta, m, v = carry
        loss, g = vg(theta, Z, y, noise, jitter)
        m = b1 * m + (1.0 - b1) * g
        v = b2 * v + (1.0 - b2) * g * g
        mhat = m / (1.0 - b1 ** t)
        vhat = v / (1.0 - b2 ** t)
        theta = theta - lr * mhat / (jnp.sqrt(vhat) + eps)
        return (theta, m, v), loss

    init = (theta0, jnp.zeros_like(theta0), jnp.zeros_like(theta0))
    ts = jnp.arange(1, n_adapt + 1, dtype=jnp.float32)
    (theta, _, _), losses = lax.scan(step, init, ts)
    return theta, losses[-1]


@functools.partial(jax.jit, static_argnames=("n_adapt",))
def _dmegp_forward(train_y, train_Z, test_Z, theta0, lr, noise, jitter, *, n_adapt):
    D = train_Z.shape[1]
    theta, last_loss = _adapt(theta0, train_Z, train_y, noise, jitter, lr, n_adapt)
    ls = jnp.exp(theta[:D])
    var = jnp.exp(theta[D])
    pred_y, var_y, _ = gp_predict_pallas(train_Z, train_y, test_Z, ls, var,
                                         noise, jitter)
    return pred_y, var_y, last_loss


class DMEGP:
    """JAX/Pallas port of DMEGP's forward pass (GP branch).

    pyro GPRegression defaults: RBF lengthscale=ones(D), variance=1.0,
    noise=1.0, jitter=1e-6, zero mean function.  Parameters are initialized
    deterministically here (no checkpoint load).
    """

    def __init__(self, input_dim, random_effects_dim, mean_fn=None):
        self.input_dim = input_dim
        self.random_effects_dim = random_effects_dim
        self.mean_fn = mean_fn
        self.log_lengthscale = jnp.zeros((random_effects_dim,), jnp.float32)
        self.log_variance = jnp.zeros((), jnp.float32)
        self.noise = 1.0
        self.jitter = 1e-6

    def forward(self, train_y, train_Z, test_Z, lr, n_adapt):
        """Return p(Y_test | train_y, train_Z, test_Z): (pred_y, var_y, loss)."""
        assert n_adapt >= 1
        Zf = jnp.asarray(train_Z, jnp.float32)
        yf = jnp.asarray(train_y, jnp.float32).reshape(-1)
        Ztest = jnp.asarray(test_Z, jnp.float32)
        # "clone" the GP params (copy.deepcopy + load_state_dict in PyTorch).
        theta0 = jnp.concatenate([self.log_lengthscale,
                                  jnp.reshape(self.log_variance, (1,))])
        # TODO(synk): pyro's Trace_ELBO loss_fn + torch.optim.Adam reverse-mode-AD
        # loop has no Pallas equivalent; the exact-GP NLL + Adam adaptation runs as
        # a jitted lax.scan (jax.value_and_grad) while the GP kernel-matrix / solve
        # / predict / NLL hot path runs in the single Pallas kernel call.
        return _dmegp_forward(yf, Zf, Ztest, theta0,
                              jnp.asarray(lr, jnp.float32),
                              jnp.asarray(self.noise, jnp.float32),
                              jnp.asarray(self.jitter, jnp.float32),
                              n_adapt=int(n_adapt))

    __call__ = forward


# ----------------------------------------------------------------------------
# Pure-JAX reference of the GP predict path (for validating the Pallas kernel).
# ----------------------------------------------------------------------------
def _ref_predict(Z, y, Ztest, ls, var, noise, jitter):
    Z1 = Z / ls
    Z2 = Ztest / ls
    sq1 = jnp.sum(Z1 * Z1, axis=1)
    sq2 = jnp.sum(Z2 * Z2, axis=1)
    r2ff = jnp.maximum(sq1[:, None] + sq1[None, :] - 2.0 * Z1 @ Z1.T, 0.0)
    r2fs = jnp.maximum(sq1[:, None] + sq2[None, :] - 2.0 * Z1 @ Z2.T, 0.0)
    K = var * jnp.exp(-0.5 * r2ff) + (noise + jitter) * jnp.eye(Z.shape[0])
    Kfs = var * jnp.exp(-0.5 * r2fs)
    Kinv_y = jnp.linalg.solve(K, y)
    pred = Kfs.T @ Kinv_y
    W = jnp.linalg.solve(K, Kfs)
    varr = var + noise - jnp.sum(W * Kfs, axis=0)
    _, logdet = jnp.linalg.slogdet(K)
    nll = (0.5 * jnp.dot(y, Kinv_y) + 0.5 * logdet
           + 0.5 * Z.shape[0] * math.log(2.0 * math.pi))
    return pred, varr, nll


if __name__ == "__main__":
    import numpy as np

    key = jax.random.PRNGKey(0)
    k1, k2, k3, k4 = jax.random.split(key, 4)

    input_dim = 6                 # unused by forward(); part of module __init__
    D = 4                         # random_effects_dim
    N, M = 8, 8                   # train / test points per task
    B = 2                         # tasks for the batched-kernel validation

    train_Z = jax.random.normal(k1, (N, D), jnp.float32)
    test_Z = jax.random.normal(k2, (M, D), jnp.float32)
    train_y = jax.random.normal(k3, (N,), jnp.float32)

    # Full forward: jitted (Adam lax.scan adaptation + one Pallas GP predict).
    model = DMEGP(input_dim, D)
    pred_y, var_y, loss = model.forward(train_y, train_Z, test_Z, lr=0.05, n_adapt=3)
    jax.block_until_ready((pred_y, var_y, loss))
    assert pred_y.shape == (M,) and var_y.shape == (M,) and loss.shape == ()
    assert bool(jnp.all(jnp.isfinite(pred_y))) and bool(jnp.all(jnp.isfinite(var_y)))
    assert bool(jnp.isfinite(loss))

    # Validate the batched Pallas GP kernel against a plain-JAX reference
    # (per-task ARD lengthscales and variances).
    bZ = jax.random.normal(k1, (B, N, D), jnp.float32)
    bZt = jax.random.normal(k2, (B, M, D), jnp.float32)
    by = jax.random.normal(k3, (B, N), jnp.float32)
    bls = 1.0 + 0.5 * jnp.abs(jax.random.normal(k4, (B, D), jnp.float32))
    bvar = jnp.array([1.0, 1.7], jnp.float32)

    p_k, v_k, l_k = gp_predict_pallas_batched(bZ, by, bZt, bls, bvar, 1.0, 1e-6)
    jax.block_until_ready((p_k, v_k, l_k))
    for b in range(B):
        p_r, v_r, l_r = _ref_predict(bZ[b], by[b], bZt[b], bls[b], bvar[b], 1.0, 1e-6)
        np.testing.assert_allclose(np.asarray(p_k[b]), np.asarray(p_r),
                                   rtol=2e-3, atol=2e-3)
        np.testing.assert_allclose(np.asarray(v_k[b]), np.asarray(v_r),
                                   rtol=2e-3, atol=2e-3)
        np.testing.assert_allclose(float(l_k[b]), float(l_r), rtol=2e-3, atol=2e-3)

    print("KERNEL_OK")
</pallas_src>

<mosaic_0001>
module attributes {stable_mosaic.version = 11 : i64} {
  func.func @_gp_kernel(%arg0: i32, %arg1: memref<1x4xf32, #tpu.memory_space<smem>>, %arg2: memref<1x1x4xf32, #tpu.memory_space<vmem>>, %arg3: memref<1x8x4xf32, #tpu.memory_space<vmem>>, %arg4: memref<1x8x4xf32, #tpu.memory_space<vmem>>, %arg5: memref<1x1x8xf32, #tpu.memory_space<vmem>>, %arg6: memref<1x2x8xf32, #tpu.memory_space<vmem>>, %arg7: memref<1x1x1xf32, #tpu.memory_space<vmem>>) attributes {dimension_semantics = [#tpu.dimension_semantics<parallel>], iteration_bounds = array<i64: 1>, scalar_prefetch = 1 : i64, scratch_operands = 0 : i64, tpu.core_type = #tpu.core_type<tc>, window_params = [{transform_indices = @transform_0, window_bounds = array<i64: 1, 1, 4>}, {transform_indices = @transform_1, window_bounds = array<i64: 1, 8, 4>}, {transform_indices = @transform_2, window_bounds = array<i64: 1, 8, 4>}, {transform_indices = @transform_3, window_bounds = array<i64: 1, 1, 8>}, {transform_indices = @transform_4, window_bounds = array<i64: 1, 2, 8>}, {transform_indices = @transform_5, window_bounds = array<i64: 1, 1, 1>}]} {
    %0 = arith.index_cast %arg0 : i32 to index
    %c0 = arith.constant 0 : index
    %1 = memref.load %arg1[%0, %c0] : memref<1x4xf32, #tpu.memory_space<smem>>
    %2 = arith.index_cast %arg0 : i32 to index
    %c1 = arith.constant 1 : index
    %3 = memref.load %arg1[%2, %c1] : memref<1x4xf32, #tpu.memory_space<smem>>
    %4 = arith.index_cast %arg0 : i32 to index
    %c2 = arith.constant 2 : index
    %5 = memref.load %arg1[%4, %c2] : memref<1x4xf32, #tpu.memory_space<smem>>
    %c0_0 = arith.constant 0 : index
    %c0_1 = arith.constant 0 : index
    %c0_2 = arith.constant 0 : index
    %6 = vector.load %arg2[%c0_0, %c0_1, %c0_2] : memref<1x1x4xf32, #tpu.memory_space<vmem>>, vector<1x1x4xf32>
    %7 = vector.shape_cast %6 : vector<1x1x4xf32> to vector<1x4xf32>
    %c0_3 = arith.constant 0 : index
    %c0_4 = arith.constant 0 : index
    %c0_5 = arith.constant 0 : index
    %8 = vector.load %arg3[%c0_3, %c0_4, %c0_5] : memref<1x8x4xf32, #tpu.memory_space<vmem>>, vector<1x8x4xf32>
    %9 = vector.shape_cast %8 : vector<1x8x4xf32> to vector<8x4xf32>
    %10 = vector.broadcast %7 : vector<1x4xf32> to vector<8x4xf32>
    %11 = arith.divf %9, %10 : vector<8x4xf32>
    %c0_6 = arith.constant 0 : index
    %c0_7 = arith.constant 0 : index
    %c0_8 = arith.constant 0 : index
    %12 = vector.load %arg4[%c0_6, %c0_7, %c0_8] : memref<1x8x4xf32, #tpu.memory_space<vmem>>, vector<1x8x4xf32>
    %13 = vector.shape_cast %12 : vector<1x8x4xf32> to vector<8x4xf32>
    %14 = vector.broadcast %7 : vector<1x4xf32> to vector<8x4xf32>
    %15 = arith.divf %13, %14 : vector<8x4xf32>
    %c0_9 = arith.constant 0 : index
    %c0_10 = arith.constant 0 : index
    %c0_11 = arith.constant 0 : index
    %16 = vector.load %arg5[%c0_9, %c0_10, %c0_11] : memref<1x1x8xf32, #tpu.memory_space<vmem>>, vector<1x1x8xf32>
    %17 = vector.shape_cast %16 : vector<1x1x8xf32> to vector<1x8xf32>
    %18 = arith.mulf %11, %11 : vector<8x4xf32>
    %19 = arith.mulf %15, %15 : vector<8x4xf32>
    %cst = arith.constant 1.000000e+00 : f32
    %20 = vector.broadcast %cst : f32 to vector<1x4xf32>
    %cst_12 = arith.constant dense<0.000000e+00> : vector<8xf32>
    %21 = vector.multi_reduction <add>, %18, %cst_12 [1] : vector<8x4xf32> to vector<8xf32>
    %22 = vector.shape_cast %21 : vector<8xf32> to vector<8x1xf32>
    %cst_13 = arith.constant dense<0.000000e+00> : vector<1x8xf32>
    %23 = tpu.matmul %20, %18, %cst_13 {dimension_numbers = #tpu.dot_dimension_numbers<[1], [1], [0], [0], [0, 0, 1, 0], [], []>} : vector<1x4xf32>, vector<8x4xf32>, vector<1x8xf32> -> vector<1x8xf32>
    %cst_14 = arith.constant dense<0.000000e+00> : vector<1x8xf32>
    %24 = tpu.matmul %20, %19, %cst_14 {dimension_numbers = #tpu.dot_dimension_numbers<[1], [1], [0], [0], [0, 0, 1, 0], [], []>} : vector<1x4xf32>, vector<8x4xf32>, vector<1x8xf32> -> vector<1x8xf32>
    %cst_15 = arith.constant dense<0.000000e+00> : vector<8x8xf32>
    %25 = tpu.matmul %11, %11, %cst_15 {dimension_numbers = #tpu.dot_dimension_numbers<[1], [1], [0], [0], [0, 0, 1, 0], [], []>} : vector<8x4xf32>, vector<8x4xf32>, vector<8x8xf32> -> vector<8x8xf32>
    %cst_16 = arith.constant dense<0.000000e+00> : vector<8x8xf32>
    %26 = tpu.matmul %11, %15, %cst_16 {dimension_numbers = #tpu.dot_dimension_numbers<[1], [1], [0], [0], [0, 0, 1, 0], [], []>} : vector<8x4xf32>, vector<8x4xf32>, vector<8x8xf32> -> vector<8x8xf32>
    %27 = vector.broadcast %22 : vector<8x1xf32> to vector<8x8xf32>
    %28 = vector.broadcast %23 : vector<1x8xf32> to vector<8x8xf32>
    %29 = arith.addf %27, %28 : vector<8x8xf32>
    %cst_17 = arith.constant 2.000000e+00 : f32
    %30 = vector.broadcast %cst_17 : f32 to vector<8x8xf32>
    %31 = arith.mulf %30, %25 : vector<8x8xf32>
    %32 = arith.subf %29, %31 : vector<8x8xf32>
    %cst_18 = arith.constant 0.000000e+00 : f32
    %33 = vector.broadcast %cst_18 : f32 to vector<8x8xf32>
    %34 = arith.maximumf %32, %33 : vector<8x8xf32>
    %35 = vector.broadcast %22 : vector<8x1xf32> to vector<8x8xf32>
    %36 = vector.broadcast %24 : vector<1x8xf32> to vector<8x8xf32>
    %37 = arith.addf %35, %36 : vector<8x8xf32>
    %cst_19 = arith.constant 2.000000e+00 : f32
    %38 = vector.broadcast %cst_19 : f32 to vector<8x8xf32>
    %39 = arith.mulf %38, %26 : vector<8x8xf32>
    %40 = arith.subf %37, %39 : vector<8x8xf32>
    %cst_20 = arith.constant 0.000000e+00 : f32
    %41 = vector.broadcast %cst_20 : f32 to vector<8x8xf32>
    %42 = arith.maximumf %40, %41 : vector<8x8xf32>
    %43 = tpu.iota {dimensions = array<i32: 0>} : vector<8x8xi32>
    %44 = tpu.iota {dimensions = array<i32: 1>} : vector<8x8xi32>
    %45 = arith.cmpi eq, %43, %44 : vector<8x8xi32>
    %46 = arith.extui %45 : vector<8x8xi1> to vector<8x8xi32>
    %47 = arith.sitofp %46 : vector<8x8xi32> to vector<8x8xf32>
    %cst_21 = arith.constant -5.000000e-01 : f32
    %48 = vector.broadcast %cst_21 : f32 to vector<8x8xf32>
    %49 = arith.mulf %48, %34 : vector<8x8xf32>
    %50 = math.exp %49 : vector<8x8xf32>
    %51 = vector.broadcast %1 : f32 to vector<8x8xf32>
    %52 = arith.mulf %51, %50 : vector<8x8xf32>
    %53 = arith.addf %3, %5 : f32
    %54 = vector.broadcast %53 : f32 to vector<8x8xf32>
    %55 = arith.mulf %54, %47 : vector<8x8xf32>
    %56 = arith.addf %52, %55 : vector<8x8xf32>
    %cst_22 = arith.constant -5.000000e-01 : f32
    %57 = vector.broadcast %cst_22 : f32 to vector<8x8xf32>
    %58 = arith.mulf %57, %42 : vector<8x8xf32>
    %59 = math.exp %58 : vector<8x8xf32>
    %60 = vector.broadcast %1 : f32 to vector<8x8xf32>
    %61 = arith.mulf %60, %59 : vector<8x8xf32>
    %62 = tpu.concatenate %56, %47 in 0 : vector<8x8xf32>, vector<8x8xf32> -> vector<16x8xf32>
    %63 = tpu.iota {dimensions = array<i32: 1>} : vector<1x8xi32>
    %cst_23 = arith.constant 0.000000e+00 : f32
    %64 = vector.broadcast %cst_23 : f32 to vector<1x1xf32>
    %65 = vector.extract_strided_slice %62 {offsets = [0, 0], sizes = [1, 1], strides = [1, 1]} : vector<16x8xf32> to vector<1x1xf32>
    %66 = math.log %65 : vector<1x1xf32>
    %67 = arith.addf %64, %66 : vector<1x1xf32>
    %cst_24 = arith.constant 1.000000e+00 : f32
    %68 = vector.broadcast %cst_24 : f32 to vector<1x1xf32>
    %69 = arith.divf %68, %65 : vector<1x1xf32>
    %70 = vector.extract_strided_slice %62 {offsets = [0, 0], sizes = [16, 1], strides = [1, 1]} : vector<16x8xf32> to vector<16x1xf32>
    %71 = vector.broadcast %69 : vector<1x1xf32> to vector<16x1xf32>
    %72 = arith.mulf %70, %71 : vector<16x1xf32>
    %c0_i32 = arith.constant 0 : i32
    %73 = vector.broadcast %c0_i32 : i32 to vector<1x8xi32>
    %74 = arith.cmpi eq, %63, %73 : vector<1x8xi32>
    %75 = vector.extract_strided_slice %62 {offsets = [0, 0], sizes = [1, 8], strides = [1, 1]} : vector<16x8xf32> to vector<1x8xf32>
    %cst_25 = arith.constant 0.000000e+00 : f32
    %76 = vector.broadcast %cst_25 : f32 to vector<1x8xf32>
    %77 = arith.select %74, %76, %75 : vector<1x8xi1>, vector<1x8xf32>
    %c0_i32_26 = arith.constant 0 : i32
    %78 = vector.broadcast %c0_i32_26 : i32 to vector<1x8xi32>
    %79 = arith.cmpi eq, %63, %78 : vector<1x8xi32>
    %80 = vector.broadcast %72 : vector<16x1xf32> to vector<16x8xf32>
    %81 = vector.broadcast %77 : vector<1x8xf32> to vector<16x8xf32>
    %82 = arith.mulf %80, %81 : vector<16x8xf32>
    %83 = arith.subf %62, %82 : vector<16x8xf32>
    %84 = vector.shape_cast %79 : vector<1x8xi1> to vector<1x8xi1>
    %85 = vector.broadcast %84 : vector<1x8xi1> to vector<16x8xi1>
    %86 = vector.shape_cast %72 : vector<16x1xf32> to vector<16x1xf32>
    %87 = vector.broadcast %86 : vector<16x1xf32> to vector<16x8xf32>
    %88 = arith.select %85, %87, %83 : vector<16x8xi1>, vector<16x8xf32>
    %89 = vector.extract_strided_slice %88 {offsets = [1, 1], sizes = [1, 1], strides = [1, 1]} : vector<16x8xf32> to vector<1x1xf32>
    %90 = math.log %89 : vector<1x1xf32>
    %91 = arith.addf %67, %90 : vector<1x1xf32>
    %cst_27 = arith.constant 1.000000e+00 : f32
    %92 = vector.broadcast %cst_27 : f32 to vector<1x1xf32>
    %93 = arith.divf %92, %89 : vector<1x1xf32>
    %94 = vector.extract_strided_slice %88 {offsets = [0, 1], sizes = [16, 1], strides = [1, 1]} : vector<16x8xf32> to vector<16x1xf32>
    %95 = vector.broadcast %93 : vector<1x1xf32> to vector<16x1xf32>
    %96 = arith.mulf %94, %95 : vector<16x1xf32>
    %c1_i32 = arith.constant 1 : i32
    %97 = vector.broadcast %c1_i32 : i32 to vector<1x8xi32>
    %98 = arith.cmpi eq, %63, %97 : vector<1x8xi32>
    %99 = vector.extract_strided_slice %88 {offsets = [1, 0], sizes = [1, 8], strides = [1, 1]} : vector<16x8xf32> to vector<1x8xf32>
    %cst_28 = arith.constant 0.000000e+00 : f32
    %100 = vector.broadcast %cst_28 : f32 to vector<1x8xf32>
    %101 = arith.select %98, %100, %99 : vector<1x8xi1>, vector<1x8xf32>
    %c1_i32_29 = arith.constant 1 : i32
    %102 = vector.broadcast %c1_i32_29 : i32 to vector<1x8xi32>
    %103 = arith.cmpi eq, %63, %102 : vector<1x8xi32>
    %104 = vector.broadcast %96 : vector<16x1xf32> to vector<16x8xf32>
    %105 = vector.broadcast %101 : vector<1x8xf32> to vector<16x8xf32>
    %106 = arith.mulf %104, %105 : vector<16x8xf32>
    %107 = arith.subf %88, %106 : vector<16x8xf32>
    %108 = vector.shape_cast %103 : vector<1x8xi1> to vector<1x8xi1>
    %109 = vector.broadcast %108 : vector<1x8xi1> to vector<16x8xi1>
    %110 = vector.shape_cast %96 : vector<16x1xf32> to vector<16x1xf32>
    %111 = vector.broadcast %110 : vector<16x1xf32> to vector<16x8xf32>
    %112 = arith.select %109, %111, %107 : vector<16x8xi1>, vector<16x8xf32>
    %113 = vector.extract_strided_slice %112 {offsets = [2, 2], sizes = [1, 1], strides = [1, 1]} : vector<16x8xf32> to vector<1x1xf32>
    %114 = math.log %113 : vector<1x1xf32>
    %115 = arith.addf %91, %114 : vector<1x1xf32>
    %cst_30 = arith.constant 1.000000e+00 : f32
    %116 = vector.broadcast %cst_30 : f32 to vector<1x1xf32>
    %117 = arith.divf %116, %113 : vector<1x1xf32>
    %118 = vector.extract_strided_slice %112 {offsets = [0, 2], sizes = [16, 1], strides = [1, 1]} : vector<16x8xf32> to vector<16x1xf32>
    %119 = vector.broadcast %117 : vector<1x1xf32> to vector<16x1xf32>
    %120 = arith.mulf %118, %119 : vector<16x1xf32>
    %c2_i32 = arith.constant 2 : i32
    %121 = vector.broadcast %c2_i32 : i32 to vector<1x8xi32>
    %122 = arith.cmpi eq, %63, %121 : vector<1x8xi32>
    %123 = vector.extract_strided_slice %112 {offsets = [2, 0], sizes = [1, 8], strides = [1, 1]} : vector<16x8xf32> to vector<1x8xf32>
    %cst_31 = arith.constant 0.000000e+00 : f32
    %124 = vector.broadcast %cst_31 : f32 to vector<1x8xf32>
    %125 = arith.select %122, %124, %123 : vector<1x8xi1>, vector<1x8xf32>
    %c2_i32_32 = arith.constant 2 : i32
    %126 = vector.broadcast %c2_i32_32 : i32 to vector<1x8xi32>
    %127 = arith.cmpi eq, %63, %126 : vector<1x8xi32>
    %128 = vector.broadcast %120 : vector<16x1xf32> to vector<16x8xf32>
    %129 = vector.broadcast %125 : vector<1x8xf32> to vector<16x8xf32>
    %130 = arith.mulf %128, %129 : vector<16x8xf32>
    %131 = arith.subf %112, %130 : vector<16x8xf32>
    %132 = vector.shape_cast %127 : vector<1x8xi1> to vector<1x8xi1>
    %133 = vector.broadcast %132 : vector<1x8xi1> to vector<16x8xi1>
    %134 = vector.shape_cast %120 : vector<16x1xf32> to vector<16x1xf32>
    %135 = vector.broadcast %134 : vector<16x1xf32> to vector<16x8xf32>
    %136 = arith.select %133, %135, %131 : vector<16x8xi1>, vector<16x8xf32>
    %137 = vector.extract_strided_slice %136 {offsets = [3, 3], sizes = [1, 1], strides = [1, 1]} : vector<16x8xf32> to vector<1x1xf32>
    %138 = math.log %137 : vector<1x1xf32>
    %139 = arith.addf %115, %138 : vector<1x1xf32>
    %cst_33 = arith.constant 1.000000e+00 : f32
    %140 = vector.broadcast %cst_33 : f32 to vector<1x1xf32>
    %141 = arith.divf %140, %137 : vector<1x1xf32>
    %142 = vector.extract_strided_slice %136 {offsets = [0, 3], sizes = [16, 1], strides = [1, 1]} : vector<16x8xf32> to vector<16x1xf32>
    %143 = vector.broadcast %141 : vector<1x1xf32> to vector<16x1xf32>
    %144 = arith.mulf %142, %143 : vector<16x1xf32>
    %c3_i32 = arith.constant 3 : i32
    %145 = vector.broadcast %c3_i32 : i32 to vector<1x8xi32>
    %146 = arith.cmpi eq, %63, %145 : vector<1x8xi32>
    %147 = vector.extract_strided_slice %136 {offsets = [3, 0], sizes = [1, 8], strides = [1, 1]} : vector<16x8xf32> to vector<1x8xf32>
    %cst_34 = arith.constant 0.000000e+00 : f32
    %148 = vector.broadcast %cst_34 : f32 to vector<1x8xf32>
    %149 = arith.select %146, %148, %147 : vector<1x8xi1>, vector<1x8xf32>
    %c3_i32_35 = arith.constant 3 : i32
    %150 = vector.broadcast %c3_i32_35 : i32 to vector<1x8xi32>
    %151 = arith.cmpi eq, %63, %150 : vector<1x8xi32>
    %152 = vector.broadcast %144 : vector<16x1xf32> to vector<16x8xf32>
    %153 = vector.broadcast %149 : vector<1x8xf32> to vector<16x8xf32>
    %154 = arith.mulf %152, %153 : vector<16x8xf32>
    %155 = arith.subf %136, %154 : vector<16x8xf32>
    %156 = vector.shape_cast %151 : vector<1x8xi1> to vector<1x8xi1>
    %157 = vector.broadcast %156 : vector<1x8xi1> to vector<16x8xi1>
    %158 = vector.shape_cast %144 : vector<16x1xf32> to vector<16x1xf32>
    %159 = vector.broadcast %158 : vector<16x1xf32> to vector<16x8xf32>
    %160 = arith.select %157, %159, %155 : vector<16x8xi1>, vector<16x8xf32>
    %161 = vector.extract_strided_slice %160 {offsets = [4, 4], sizes = [1, 1], strides = [1, 1]} : vector<16x8xf32> to vector<1x1xf32>
    %162 = math.log %161 : vector<1x1xf32>
    %163 = arith.addf %139, %162 : vector<1x1xf32>
    %cst_36 = arith.constant 1.000000e+00 : f32
    %164 = vector.broadcast %cst_36 : f32 to vector<1x1xf32>
    %165 = arith.divf %164, %161 : vector<1x1xf32>
    %166 = vector.extract_strided_slice %160 {offsets = [0, 4], sizes = [16, 1], strides = [1, 1]} : vector<16x8xf32> to vector<16x1xf32>
    %167 = vector.broadcast %165 : vector<1x1xf32> to vector<16x1xf32>
    %168 = arith.mulf %166, %167 : vector<16x1xf32>
    %c4_i32 = arith.constant 4 : i32
    %169 = vector.broadcast %c4_i32 : i32 to vector<1x8xi32>
    %170 = arith.cmpi eq, %63, %169 : vector<1x8xi32>
    %171 = vector.extract_strided_slice %160 {offsets = [4, 0], sizes = [1, 8], strides = [1, 1]} : vector<16x8xf32> to vector<1x8xf32>
    %cst_37 = arith.constant 0.000000e+00 : f32
    %172 = vector.broadcast %cst_37 : f32 to vector<1x8xf32>
    %173 = arith.select %170, %172, %171 : vector<1x8xi1>, vector<1x8xf32>
    %c4_i32_38 = arith.constant 4 : i32
    %174 = vector.broadcast %c4_i32_38 : i32 to vector<1x8xi32>
    %175 = arith.cmpi eq, %63, %174 : vector<1x8xi32>
    %176 = vector.broadcast %168 : vector<16x1xf32> to vector<16x8xf32>
    %177 = vector.broadcast %173 : vector<1x8xf32> to vector<16x8xf32>
    %178 = arith.mulf %176, %177 : vector<16x8xf32>
    %179 = arith.subf %160, %178 : vector<16x8xf32>
    %180 = vector.shape_cast %175 : vector<1x8xi1> to vector<1x8xi1>
    %181 = vector.broadcast %180 : vector<1x8xi1> to vector<16x8xi1>
    %182 = vector.shape_cast %168 : vector<16x1xf32> to vector<16x1xf32>
    %183 = vector.broadcast %182 : vector<16x1xf32> to vector<16x8xf32>
    %184 = arith.select %181, %183, %179 : vector<16x8xi1>, vector<16x8xf32>
    %185 = vector.extract_strided_slice %184 {offsets = [5, 5], sizes = [1, 1], strides = [1, 1]} : vector<16x8xf32> to vector<1x1xf32>
    %186 = math.log %185 : vector<1x1xf32>
    %187 = arith.addf %163, %186 : vector<1x1xf32>
    %cst_39 = arith.constant 1.000000e+00 : f32
    %188 = vector.broadcast %cst_39 : f32 to vector<1x1xf32>
    %189 = arith.divf %188, %185 : vector<1x1xf32>
    %190 = vector.extract_strided_slice %184 {offsets = [0, 5], sizes = [16, 1], strides = [1, 1]} : vector<16x8xf32> to vector<16x1xf32>
    %191 = vector.broadcast %189 : vector<1x1xf32> to vector<16x1xf32>
    %192 = arith.mulf %190, %191 : vector<16x1xf32>
    %c5_i32 = arith.constant 5 : i32
    %193 = vector.broadcast %c5_i32 : i32 to vector<1x8xi32>
    %194 = arith.cmpi eq, %63, %193 : vector<1x8xi32>
    %195 = vector.extract_strided_slice %184 {offsets = [5, 0], sizes = [1, 8], strides = [1, 1]} : vector<16x8xf32> to vector<1x8xf32>
    %cst_40 = arith.constant 0.000000e+00 : f32
    %196 = vector.broadcast %cst_40 : f32 to vector<1x8xf32>
    %197 = arith.select %194, %196, %195 : vector<1x8xi1>, vector<1x8xf32>
    %c5_i32_41 = arith.constant 5 : i32
    %198 = vector.broadcast %c5_i32_41 : i32 to vector<1x8xi32>
    %199 = arith.cmpi eq, %63, %198 : vector<1x8xi32>
    %200 = vector.broadcast %192 : vector<16x1xf32> to vector<16x8xf32>
    %201 = vector.broadcast %197 : vector<1x8xf32> to vector<16x8xf32>
    %202 = arith.mulf %200, %201 : vector<16x8xf32>
    %203 = arith.subf %184, %202 : vector<16x8xf32>
    %204 = vector.shape_cast %199 : vector<1x8xi1> to vector<1x8xi1>
    %205 = vector.broadcast %204 : vector<1x8xi1> to vector<16x8xi1>
    %206 = vector.shape_cast %192 : vector<16x1xf32> to vector<16x1xf32>
    %207 = vector.broadcast %206 : vector<16x1xf32> to vector<16x8xf32>
    %208 = arith.select %205, %207, %203 : vector<16x8xi1>, vector<16x8xf32>
    %209 = vector.extract_strided_slice %208 {offsets = [6, 6], sizes = [1, 1], strides = [1, 1]} : vector<16x8xf32> to vector<1x1xf32>
    %210 = math.log %209 : vector<1x1xf32>
    %211 = arith.addf %187, %210 : vector<1x1xf32>
    %cst_42 = arith.constant 1.000000e+00 : f32
    %212 = vector.broadcast %cst_42 : f32 to vector<1x1xf32>
    %213 = arith.divf %212, %209 : vector<1x1xf32>
    %214 = vector.extract_strided_slice %208 {offsets = [0, 6], sizes = [16, 1], strides = [1, 1]} : vector<16x8xf32> to vector<16x1xf32>
    %215 = vector.broadcast %213 : vector<1x1xf32> to vector<16x1xf32>
    %216 = arith.mulf %214, %215 : vector<16x1xf32>
    %c6_i32 = arith.constant 6 : i32
    %217 = vector.broadcast %c6_i32 : i32 to vector<1x8xi32>
    %218 = arith.cmpi eq, %63, %217 : vector<1x8xi32>
    %219 = vector.extract_strided_slice %208 {offsets = [6, 0], sizes = [1, 8], strides = [1, 1]} : vector<16x8xf32> to vector<1x8xf32>
    %cst_43 = arith.constant 0.000000e+00 : f32
    %220 = vector.broadcast %cst_43 : f32 to vector<1x8xf32>
    %221 = arith.select %218, %220, %219 : vector<1x8xi1>, vector<1x8xf32>
    %c6_i32_44 = arith.constant 6 : i32
    %222 = vector.broadcast %c6_i32_44 : i32 to vector<1x8xi32>
    %223 = arith.cmpi eq, %63, %222 : vector<1x8xi32>
    %224 = vector.broadcast %216 : vector<16x1xf32> to vector<16x8xf32>
    %225 = vector.broadcast %221 : vector<1x8xf32> to vector<16x8xf32>
    %226 = arith.mulf %224, %225 : vector<16x8xf32>
    %227 = arith.subf %208, %226 : vector<16x8xf32>
    %228 = vector.shape_cast %223 : vector<1x8xi1> to vector<1x8xi1>
    %229 = vector.broadcast %228 : vector<1x8xi1> to vector<16x8xi1>
    %230 = vector.shape_cast %216 : vector<16x1xf32> to vector<16x1xf32>
    %231 = vector.broadcast %230 : vector<16x1xf32> to vector<16x8xf32>
    %232 = arith.select %229, %231, %227 : vector<16x8xi1>, vector<16x8xf32>
    %233 = vector.extract_strided_slice %232 {offsets = [7, 7], sizes = [1, 1], strides = [1, 1]} : vector<16x8xf32> to vector<1x1xf32>
    %234 = math.log %233 : vector<1x1xf32>
    %235 = arith.addf %211, %234 : vector<1x1xf32>
    %cst_45 = arith.constant 1.000000e+00 : f32
    %236 = vector.broadcast %cst_45 : f32 to vector<1x1xf32>
    %237 = arith.divf %236, %233 : vector<1x1xf32>
    %238 = vector.extract_strided_slice %232 {offsets = [0, 7], sizes = [16, 1], strides = [1, 1]} : vector<16x8xf32> to vector<16x1xf32>
    %239 = vector.broadcast %237 : vector<1x1xf32> to vector<16x1xf32>
    %240 = arith.mulf %238, %239 : vector<16x1xf32>
    %c7_i32 = arith.constant 7 : i32
    %241 = vector.broadcast %c7_i32 : i32 to vector<1x8xi32>
    %242 = arith.cmpi eq, %63, %241 : vector<1x8xi32>
    %243 = vector.extract_strided_slice %232 {offsets = [7, 0], sizes = [1, 8], strides = [1, 1]} : vector<16x8xf32> to vector<1x8xf32>
    %cst_46 = arith.constant 0.000000e+00 : f32
    %244 = vector.broadcast %cst_46 : f32 to vector<1x8xf32>
    %245 = arith.select %242, %244, %243 : vector<1x8xi1>, vector<1x8xf32>
    %c7_i32_47 = arith.constant 7 : i32
    %246 = vector.broadcast %c7_i32_47 : i32 to vector<1x8xi32>
    %247 = arith.cmpi eq, %63, %246 : vector<1x8xi32>
    %248 = vector.broadcast %240 : vector<16x1xf32> to vector<16x8xf32>
    %249 = vector.broadcast %245 : vector<1x8xf32> to vector<16x8xf32>
    %250 = arith.mulf %248, %249 : vector<16x8xf32>
    %251 = arith.subf %232, %250 : vector<16x8xf32>
    %252 = vector.shape_cast %247 : vector<1x8xi1> to vector<1x8xi1>
    %253 = vector.broadcast %252 : vector<1x8xi1> to vector<16x8xi1>
    %254 = vector.shape_cast %240 : vector<16x1xf32> to vector<16x1xf32>
    %255 = vector.broadcast %254 : vector<16x1xf32> to vector<16x8xf32>
    %256 = arith.select %253, %255, %251 : vector<16x8xi1>, vector<16x8xf32>
    %257 = vector.extract_strided_slice %256 {offsets = [8, 0], sizes = [8, 8], strides = [1, 1]} : vector<16x8xf32> to vector<8x8xf32>
    %cst_48 = arith.constant dense<0.000000e+00> : vector<1x8xf32>
    %258 = tpu.matmul %17, %257, %cst_48 {dimension_numbers = #tpu.dot_dimension_numbers<[1], [0], [0], [1], [0, 0, 1, 1], [], []>} : vector<1x8xf32>, vector<8x8xf32>, vector<1x8xf32> -> vector<1x8xf32>
    %cst_49 = arith.constant dense<0.000000e+00> : vector<1x8xf32>
    %259 = tpu.matmul %258, %61, %cst_49 {dimension_numbers = #tpu.dot_dimension_numbers<[1], [0], [0], [1], [0, 0, 1, 1], [], []>} : vector<1x8xf32>, vector<8x8xf32>, vector<1x8xf32> -> vector<1x8xf32>
    %cst_50 = arith.constant dense<0.000000e+00> : vector<8x8xf32>
    %260 = tpu.matmul %257, %61, %cst_50 {dimension_numbers = #tpu.dot_dimension_numbers<[1], [0], [0], [1], [0, 0, 1, 1], [], []>} : vector<8x8xf32>, vector<8x8xf32>, vector<8x8xf32> -> vector<8x8xf32>
    %261 = arith.mulf %260, %61 : vector<8x8xf32>
    %cst_51 = arith.constant dense<0.000000e+00> : vector<8xf32>
    %262 = vector.multi_reduction <add>, %261, %cst_51 [0] : vector<8x8xf32> to vector<8xf32>
    %263 = vector.shape_cast %262 : vector<8xf32> to vector<1x8xf32>
    %264 = arith.addf %1, %3 : f32
    %265 = vector.broadcast %264 : f32 to vector<1x8xf32>
    %266 = arith.subf %265, %263 : vector<1x8xf32>
    %cst_52 = arith.constant 0.000000e+00 : f32
    %267 = vector.broadcast %cst_52 : f32 to vector<1x8xf32>
    %268 = arith.maximumf %266, %267 : vector<1x8xf32>
    %269 = arith.mulf %258, %17 : vector<1x8xf32>
    %cst_53 = arith.constant dense<0.000000e+00> : vector<1xf32>
    %270 = vector.multi_reduction <add>, %269, %cst_53 [1] : vector<1x8xf32> to vector<1xf32>
    %271 = vector.shape_cast %270 : vector<1xf32> to vector<1x1xf32>
    %cst_54 = arith.constant 5.000000e-01 : f32
    %272 = vector.broadcast %cst_54 : f32 to vector<1x1xf32>
    %273 = arith.mulf %272, %271 : vector<1x1xf32>
    %cst_55 = arith.constant 5.000000e-01 : f32
    %274 = vector.broadcast %cst_55 : f32 to vector<1x1xf32>
    %275 = arith.mulf %274, %235 : vector<1x1xf32>
    %276 = arith.addf %273, %275 : vector<1x1xf32>
    %cst_56 = arith.constant 7.35150814 : f32
    %277 = vector.broadcast %cst_56 : f32 to vector<1x1xf32>
    %278 = arith.addf %276, %277 : vector<1x1xf32>
    %c0_57 = arith.constant 0 : index
    %c0_58 = arith.constant 0 : index
    %c0_59 = arith.constant 0 : index
    %279 = vector.load %arg6[%c0_57, %c0_58, %c0_59] : memref<1x2x8xf32, #tpu.memory_space<vmem>>, vector<1x1x8xf32>
    %280 = vector.shape_cast %279 : vector<1x1x8xf32> to vector<1x8xf32>
    %281 = vector.shape_cast %259 : vector<1x8xf32> to vector<1x1x8xf32>
    tpu.vector_store %arg6[%c0_57, %c0_58, %c0_59], %281 {strides = array<i32>} : memref<1x2x8xf32, #tpu.memory_space<vmem>>, vector<1x1x8xf32>,
    %c0_60 = arith.constant 0 : index
    %c1_61 = arith.constant 1 : index
    %c0_62 = arith.constant 0 : index
    %282 = vector.load %arg6[%c0_60, %c1_61, %c0_62] : memref<1x2x8xf32, #tpu.memory_space<vmem>>, vector<1x1x8xf32>
    %283 = vector.shape_cast %282 : vector<1x1x8xf32> to vector<1x8xf32>
    %284 = vector.shape_cast %268 : vector<1x8xf32> to vector<1x1x8xf32>
    tpu.vector_store %arg6[%c0_60, %c1_61, %c0_62], %284 {strides = array<i32>} : memref<1x2x8xf32, #tpu.memory_space<vmem>>, vector<1x1x8xf32>,
    %c0_63 = arith.constant 0 : index
    %c0_64 = arith.constant 0 : index
    %c0_65 = arith.constant 0 : index
    %285 = vector.load %arg7[%c0_63, %c0_64, %c0_65] : memref<1x1x1xf32, #tpu.memory_space<vmem>>, vector<1x1x1xf32>
    %286 = vector.shape_cast %285 : vector<1x1x1xf32> to vector<1x1xf32>
    %287 = vector.shape_cast %278 : vector<1x1xf32> to vector<1x1x1xf32>
    tpu.vector_store %arg7[%c0_63, %c0_64, %c0_65], %287 {strides = array<i32>} : memref<1x1x1xf32, #tpu.memory_space<vmem>>, vector<1x1x1xf32>,
    return
  }
  func.func @transform_0(%arg0: i32, %arg1: memref<1x4xf32, #tpu.memory_space<smem>>) -> (i32, i32, i32) {
    %c0_i32 = arith.constant 0 : i32
    %c0_i32_0 = arith.constant 0 : i32
    %c0_i32_1 = arith.constant 0 : i32
    return %arg0, %c0_i32, %c0_i32_0 : i32, i32, i32
  }
  func.func @transform_1(%arg0: i32, %arg1: memref<1x4xf32, #tpu.memory_space<smem>>) -> (i32, i32, i32) {
    %c0_i32 = arith.constant 0 : i32
    %c0_i32_0 = arith.constant 0 : i32
    %c0_i32_1 = arith.constant 0 : i32
    return %arg0, %c0_i32, %c0_i32_0 : i32, i32, i32
  }
  func.func @transform_2(%arg0: i32, %arg1: memref<1x4xf32, #tpu.memory_space<smem>>) -> (i32, i32, i32) {
    %c0_i32 = arith.constant 0 : i32
    %c0_i32_0 = arith.constant 0 : i32
    %c0_i32_1 = arith.constant 0 : i32
    return %arg0, %c0_i32, %c0_i32_0 : i32, i32, i32
  }
  func.func @transform_3(%arg0: i32, %arg1: memref<1x4xf32, #tpu.memory_space<smem>>) -> (i32, i32, i32) {
    %c0_i32 = arith.constant 0 : i32
    %c0_i32_0 = arith.constant 0 : i32
    %c0_i32_1 = arith.constant 0 : i32
    return %arg0, %c0_i32, %c0_i32_0 : i32, i32, i32
  }
  func.func @transform_4(%arg0: i32, %arg1: memref<1x4xf32, #tpu.memory_space<smem>>) -> (i32, i32, i32) {
    %c0_i32 = arith.constant 0 : i32
    %c0_i32_0 = arith.constant 0 : i32
    %c0_i32_1 = arith.constant 0 : i32
    return %arg0, %c0_i32, %c0_i32_0 : i32, i32, i32
  }
  func.func @transform_5(%arg0: i32, %arg1: memref<1x4xf32, #tpu.memory_space<smem>>) -> (i32, i32, i32) {
    %c0_i32 = arith.constant 0 : i32
    %c0_i32_0 = arith.constant 0 : i32
    %c0_i32_1 = arith.constant 0 : i32
    return %arg0, %c0_i32, %c0_i32_0 : i32, i32, i32
  }
}

</mosaic_0001>

<bundles_post_ra>
// kernel: custom-call.39
= control target key start
LH: loop header
LB: loop body
LE: loop exit
PB: predicated region body
PF: predicated region fallthrough
CT: control target
= control target key end

     0   :  { %s6_s0 = inlined_call_operand.vmem [shape: f32[5], index: 0, kind: output, shape index: {}]  }

// kernel: custom-call.53
= control target key start
LH: loop header
LB: loop body
LE: loop exit
PB: predicated region body
PF: predicated region fallthrough
CT: control target
= control target key end

     0   :  { %s6_s0 = inlined_call_operand.vmem [shape: f32[3], index: 0, kind: output, shape index: {}]  }

// kernel: custom-call.67
= control target key start
LH: loop header
LB: loop body
LE: loop exit
PB: predicated region body
PF: predicated region fallthrough
CT: control target
= control target key end

     0   :  { %5 = vsyncpa [#allocation4], 0  ;;  %s687_s12 = smov [#allocation0]   ;;  %s779_s0 = inlined_call_operand.vmem [shape: f32[8,8], index: 0, kind: input, shape index: {}]   ;;  %s780_s1 = inlined_call_operand.vmem [shape: f32[8,8], index: 1, kind: output, shape index: {0}]   ;;  %s781_s2 = inlined_call_operand.hbm [shape: s32[8], index: 2, kind: output, shape index: {1}]   ;;  %s782_s3 = inlined_call_operand.vmem [shape: s32[8], index: 3, kind: output, shape index: {2}]  }
   0x1   :  { %s691_s15 = smov %s779_s0  }
   0x2 LB: > { %v53_v0 = vld [vmem:[%s693_s15] sm:$0xff]  ;;  %s55_s15 = scalar_lea.vmem %s693_s15, 8   ;;  %s693_s15 = sphi %s691_s15, %s55_s15   ;;  %s689_s12 = sphi %s687_s12, %s56_s12  }
   0x3   : > { %54 = vst [vmem:[%s689_s12] sm:$0xff] %v53_v0  ;;  %s56_s12 = scalar_lea.vmem %s689_s12, 8   ;;  %p50_p0 = scmp.gt.s32.totalorder %s55_s15, %s779_s0 }
   0x4   :  { %v72_v2 = vlaneseq (%p50_p0)  ;;  %v707_v3 = vmov (%p50_p0), 0   ;;  %s739_s18 = smov (%p50_p0), 0  }
   0x5   :  { %52 = sbr.rel (!%p50_p0) target bundleno = 2 (0x2), region = 152  ;;  %71 = vst [vmem:[#allocation2] sm:$0x1] (%p50_p0), %v707_v3 }
   0x6   :  { %v736_v4 = vshrl.u32 (%p50_p0), %v72_v2, 7 }
   0x8   :  { %76 = vst [vmem:[#allocation7] sm:$0xff] (%p50_p0), %v736_v4 }
   0xa   :  { %v69_v1 = vld [vmem:[#allocation0] sm:$0xff] }
   0xb   :  { %70 = vst [vmem:[#allocation1] sm:$0xff] %v69_v1 }
   0xc LB: > { %v745_v7 = vstv %s697_s18  ;;  %s133_s0 = ssub.s32 128, %s697_s18  ;;  %v139_v37 = vand.u32 127, %v72_v2  ;;  %v142_v39 = vld [vmem:[#allocation2] ss:$0 sm:$0xff]  ;;  %s145_s19 = scalar_lea.vmem [#allocation1], %s697_s18  ;;  %s697_s18 = sphi %s739_s18, %s82_s18  }
   0xd   : > { %vm91_vm0 = vcmp.ge.s32.totalorder %v736_v4, %v745_v7  ;;  %s151_s21 = scalar_lea.vmem [#allocation7], %s697_s18  ;;  %vm171_vm13 = vcmp.gt.s32.totalorder %v736_v4, %v745_v7  ;;  %s82_s18 = sadd.s32 1, %s697_s18  }
   0xe   : > { %vm163_vm10 = vcmp.gt.s32.totalorder %v139_v37, %v745_v7  ;;  %vm140_vm11 = vcmp.eq.s32.totalorder %v139_v37, %v745_v7  ;;  %p79_p1 = scmp.ge.s32.totalorder %s82_s18, 8  }
   0xf   : > { %v153_v41 = vld [vmem:[%s151_s21] ss:$0 sm:$0xff]  ;;  %vm175_vm15 = vmand %vm171_vm13, %vm140_vm11  ;;  %s699_s26 = smov (%p79_p1), %s780_s1   ;;  %s703_s27 = smov (%p79_p1), [#allocation1]  }
  0x12   : > { %v87_v5 = vld [vmem:[#allocation1] sm:$0xff]  ;;  %v147_v40 = vld [vmem:[%s145_s19] ss:$0 sm:$0xff] }
  0x13   : > { %v88_v6 = vand.u32 2147483647, %v87_v5 }
  0x15   : > { %vm470_vm1 = vcmp.gt.f32.partialorder %v88_v6, -inf }
  0x16   : > { %vm95_vm2 = vmand %vm91_vm0, %vm470_vm1 }
  0x17   : > { %v96_v8 = vsel %vm95_vm2, %v736_v4, %v745_v7  ;;  %v97_v9 = vsel %vm95_vm2, %v88_v6, -inf }
  0x18   : > { %v98_v10 = vrot.slane %v97_v9, 1  ;;  %v99_v11 = vrot.slane %v96_v8, 1 }
  0x1a   : > { %vm100_vm3 = vcmp.ge.f32.partialorder %v98_v10, %v97_v9  ;;  %v103_v12 = vrot.slane %v98_v10, 1  ;;  %v104_v13 = vrot.slane %v99_v11, 1 }
  0x1b   : > { %v101_v14 = vsel %vm100_vm3, %v98_v10, %v97_v9  ;;  %v102_v15 = vsel %vm100_vm3, %v99_v11, %v96_v8 }
  0x1c   : > { %vm105_vm4 = vcmp.ge.f32.partialorder %v103_v12, %v101_v14  ;;  %v108_v16 = vrot.slane %v103_v12, 1  ;;  %v109_v17 = vrot.slane %v104_v13, 1 }
  0x1d   : > { %v106_v18 = vsel %vm105_vm4, %v103_v12, %v101_v14  ;;  %v107_v19 = vsel %vm105_vm4, %v104_v13, %v102_v15 }
  0x1e   : > { %vm110_vm5 = vcmp.ge.f32.partialorder %v108_v16, %v106_v18  ;;  %v113_v20 = vrot.slane %v108_v16, 1  ;;  %v114_v21 = vrot.slane %v109_v17, 1 }
  0x1f   : > { %v111_v22 = vsel %vm110_vm5, %v108_v16, %v106_v18  ;;  %v112_v23 = vsel %vm110_vm5, %v109_v17, %v107_v19 }
  0x20   : > { %vm115_vm6 = vcmp.ge.f32.partialorder %v113_v20, %v111_v22  ;;  %v118_v24 = vrot.slane %v113_v20, 1  ;;  %v119_v25 = vrot.slane %v114_v21, 1 }
  0x21   : > { %v116_v26 = vsel %vm115_vm6, %v113_v20, %v111_v22  ;;  %v117_v27 = vsel %vm115_vm6, %v114_v21, %v112_v23 }
  0x22   : > { %vm120_vm7 = vcmp.ge.f32.partialorder %v118_v24, %v116_v26  ;;  %v123_v28 = vrot.slane %v118_v24, 1  ;;  %v124_v29 = vrot.slane %v119_v25, 1 }
  0x23   : > { %v121_v30 = vsel %vm120_vm7, %v118_v24, %v116_v26  ;;  %v122_v31 = vsel %vm120_vm7, %v119_v25, %v117_v27 }
  0x24   : > { %vm125_vm8 = vcmp.ge.f32.partialorder %v123_v28, %v121_v30  ;;  %v128_v32 = vrot.slane %v123_v28, 1  ;;  %v129_v33 = vrot.slane %v124_v29, 1 }
  0x25   : > { %v126_v34 = vsel %vm125_vm8, %v123_v28, %v121_v30  ;;  %v127_v35 = vsel %vm125_vm8, %v124_v29, %v122_v31 }
  0x26   : > { %vm130_vm9 = vcmp.ge.f32.partialorder %v128_v32, %v126_v34 }
  0x27   : > { %v132_v36 = vsel %vm130_vm9, %v129_v33, %v127_v35 }
  0x28   : > { %134 = vrot.lane.b32.xlu0 %v132_v36, %s133_s0 }
  0x9a   : > { %v135_v38 = vpop.permute.xlu0 %134 }
  0x9b   : > { %478 = vpush %v135_v38 }
  0xcc   : > { %s479_s20 = spop %478 }
  0xcd   : > { %v141_v42 = vstv %s479_s20  ;;  %s146_s22 = scalar_lea.vmem [#allocation1], %s479_s20  ;;  %s152_s23 = scalar_lea.vmem [#allocation7], %s479_s20 }
  0xce   : > { %v148_v43 = vld [vmem:[%s146_s22] ss:$0 sm:$0xff]  ;;  %v143_v45 = vsel %vm140_vm11, %v141_v42, %v142_v39 }
  0xcf   : > { %v154_v44 = vld [vmem:[%s152_s23] ss:$0 sm:$0xff]  ;;  %149 = vst [vmem:[%s146_s22] sm:$0x1] %v147_v40  ;;  %vm157_vm12 = vcmp.ne.f32.partialorder %v148_v43, 0.0  ;;  %144 = vst [vmem:[#allocation2] sm:$0x1] %v143_v45 }
  0xd0   : > { %155 = vst [vmem:[%s152_s23] sm:$0x1] %v153_v41  ;;  %150 = vst [vmem:[%s145_s19] sm:$0x1] %v148_v43  ;;  %v164_v52 = vsel %vm163_vm10, %v148_v43, 0.0 }
  0xd1   : > { %156 = vst [vmem:[%s151_s21] sm:$0x1] %v154_v44  ;;  %vm158_vm14 = vmand %vm140_vm11, %vm157_vm12 }
  0xd2   : > { %v159_v46 = vsel %vm158_vm14, %v148_v43, 1.0 }
  0xd3   : > { %v172_v47 = vsel %vm171_vm13, %v159_v46, 1.0 }
  0xd4   : > { %603 = vrcp.f32 %v172_v47 }
  0xd6   :  { %v235_v57 = vld [vmem:[#allocation2] sm:$0x1] (%p79_p1) }
  0xd7   : > { %v168_v49 = vld [vmem:[#allocation1] sm:$0xff]  ;;  %238 = vst [vmem:[#allocation3] sm:$0x1] (%p79_p1), %v235_v57 }
  0xd8   :  { %v182_v56 = vld [vmem:[#allocation7] sm:$0xff] (%p79_p1) }
  0xe1   : > { %v604_v48 = vpop.eup %603 }
  0xe2   : > { %v174_v50 = vmul.f32 %v604_v48, %v168_v49 }
  0xe4   : > { %v176_v51 = vsel %vm175_vm15, %v174_v50, 0.0 }
  0xe5   : > { %177 = vadd.xlane.f32.xlu0 %v176_v51 }
 0x112   :  { %198 = vxpose.xlu0.b32.start.end [1/1] (short) (narrow) (%p79_p1), %v182_v56, 8 }
 0x16e   : > { %v178_v53 = vpop.xlane.xlu0 %177 }
 0x16f   : > { %v179_v54 = vmul.f32 %v178_v53, %v164_v52  ;;  %81 = sbr.rel (!%p79_p1) target bundleno = 12 (0xc), region = 163 }
 0x171   : > { %v180_v55 = vsub.f32 %v174_v50, %v179_v54 }
 0x173   : > { %181 = vst [vmem:[#allocation1] sm:$0xff] %v180_v55 }
 0x18e   :  { %v214_v58 = vpop.trf.xlu0 }
 0x18f   :  { %230 = vst [vmem:[#allocation5] sm:$0x1] %v214_v58 }
 0x196   :  { %v243_v59 = vld [vmem:[#allocation5] sm:$0x1] }
 0x197   :  { %246 = vst [vmem:[#allocation6] sm:$0x1] %v243_v59 }
 0x198 LB: > { %v294_v60 = vld [vmem:[%s705_s27] sm:$0xff]  ;;  %s296_s27 = scalar_lea.vmem %s705_s27, 8   ;;  %s705_s27 = sphi %s703_s27, %s296_s27   ;;  %s701_s26 = sphi %s699_s26, %s297_s26  }
 0x199   : > { %295 = vst [vmem:[%s701_s26] sm:$0xff] %v294_v60  ;;  %s297_s26 = scalar_lea.vmem %s701_s26, 8   ;;  %p291_p2 = scmp.gt.s32.totalorder %s296_s27, [#allocation1] }
 0x19a   :  { %s708_s28 = smov (%p291_p2), [#allocation3]  }
 0x19b   :  { %293 = sbr.rel (!%p291_p2) target bundleno = 408 (0x198), region = 185  ;;  %s315_s29 = sshll.u32 (%p291_p2), %s708_s28, 4  ;;  %s316_s29 = int_to_ptr.vmem [resolvable:$true] %s315_s29 }
 0x19c   :  { %s605_s1 = scalar_lea.vmem (%p291_p2), %s316_s29, 16  ;;  %s609_s5 = scalar_lea.vmem (%p291_p2), %s316_s29, 32 }
 0x19d   :  { %p606_p3 = scmp.ne.s32.totalorder (%p291_p2), %s316_s29, %s605_s1  ;;  %p610_p4 = scmp.lt.s32.totalorder (%p291_p2), %s316_s29, %s316_s29 }
 0x19e   :  { %v382_v61 = vld [vmem:[#allocation6] sm:$0x1] (%p291_p2)  ;;  %p611_p5 = scmp.lt.s32.totalorder (%p291_p2), %s609_s5, %s605_s1 }
 0x19f   :  { %383 = vst [vmem:[%s782_s3] sm:$0x1] (%p291_p2), %v382_v61 }
 0x1a0   :  { %p612_p6 = por %p611_p5, %p610_p4 }
 0x1a2   :  { %p613_p7 = pnand %p612_p6, %p606_p3 }
 0x1a4   :  { %616 = shalt.err (!%p613_p7)
}
 0x1a5   :  { %318 = dma.vmem_to_hbm [thread:$0]  %s316_s29, 16, %s781_s2, [#allocation4]  }
 0x1a6   :  { %685 = dma.done.wait [#allocation4], 16  }
 0x1a7   :  { %686 = vsyncadd [#allocation4], 4294967280 }
 0x1a8   :  { %389 = vsyncpa [#allocation4], 1 }

// kernel: custom-call.69
= control target key start
LH: loop header
LB: loop body
LE: loop exit
PB: predicated region body
PF: predicated region fallthrough
CT: control target
= control target key end

     0   :  { %v35_v0 = vlaneseq  ;;  %v182_v9 = vmov -1.0   ;;  %s217_s0 = inlined_call_operand.vmem [shape: f32[1,8,8], index: 0, kind: input, shape index: {}]   ;;  %s218_s1 = inlined_call_operand.vmem [shape: f32[1,8,8], index: 1, kind: output, shape index: {}]  }
   0x1   :  { %v30_v1 = vld [vmem:[%s217_s0] sm:$0xff] }
   0x2   :  { %v196_v2 = vand.u32 127, %v35_v0  ;;  %v39_v3 = vshrl.u32 %v35_v0, 7 }
   0x4   :  { %vm37_vm0 = vcmp.lt.s32.totalorder %v196_v2, 8  ;;  %vm41_vm1 = vcmp.eq.s32.totalorder %v39_v3, %v196_v2  ;;  %vm46_vm2 = vcmp.ge.s32.totalorder %v39_v3, %v196_v2  ;;  %vm60_vm4 = vcmp.eq.s32.totalorder %v196_v2, 0 }
   0x5   :  { %v43_v4 = vsel %vm41_vm1, %v30_v1, 0.0  ;;  %vm47_vm3 = vmand %vm46_vm2, %vm37_vm0  ;;  %vm57_vm5 = vcmp.eq.s32.totalorder %v196_v2, %v39_v3  ;;  %v61_v10 = vsel %vm60_vm4, 1.0, %v182_v9  ;;  %vm68_vm6 = vcmp.eq.s32.totalorder %v196_v2, 1 }
   0x6   :  { %v48_v5 = vsel %vm47_vm3, %v30_v1, 0.0  ;;  %44 = vadd.xlane.f32.xlu0 %v43_v4  ;;  %v62_v11 = vsel %vm57_vm5, %v61_v10, 0.0  ;;  %vm78_vm7 = vcmp.eq.s32.totalorder %v196_v2, 2  ;;  %vm88_vm8 = vcmp.eq.s32.totalorder %v196_v2, 3 }
   0x7   :  { %vm98_vm9 = vcmp.eq.s32.totalorder %v196_v2, 4  ;;  %vm108_vm10 = vcmp.eq.s32.totalorder %v196_v2, 5  ;;  %vm118_vm11 = vcmp.eq.s32.totalorder %v196_v2, 6  ;;  %vm128_vm12 = vcmp.eq.s32.totalorder %v196_v2, 7 }
  0x8f   :  { %v201_v6 = vpop.xlane.xlu0 %44 }
  0x90   :  { %180 = vrcp.f32 %v201_v6  ;;  %vm135_vm13 = vweird.f32 %v201_v6 }
  0x9d   :  { %v181_v7 = vpop.eup %180 }
  0x9e   :  { %v50_v8 = vmul.f32 %v181_v7, %v48_v5 }
  0xa0   :  { %51 = vst [vmem:[#allocation2] sm:$0xff] %v50_v8 }
  0xa7   :  { %v64_v12 = vld [vmem:[#allocation2 + $0x1] ss:$0 sm:$0xff]  ;;  %v74_v15 = vld [vmem:[#allocation2 + $0x2] ss:$0 sm:$0xff]  ;;  %v84_v20 = vld [vmem:[#allocation2 + $0x3] ss:$0 sm:$0xff] }
  0xa8   :  { %v65_v13 = vxor.u32 2147483648, %v64_v12  ;;  %v75_v17 = vxor.u32 2147483648, %v74_v15  ;;  %v85_v22 = vxor.u32 2147483648, %v84_v20  ;;  %v94_v25 = vld [vmem:[#allocation2 + $0x4] ss:$0 sm:$0xff] }
  0xa9   :  { %v95_v27 = vxor.u32 2147483648, %v94_v25  ;;  %v104_v30 = vld [vmem:[#allocation2 + $0x5] ss:$0 sm:$0xff]  ;;  %v114_v35 = vld [vmem:[#allocation2 + $0x6] ss:$0 sm:$0xff] }
  0xaa   :  { %v69_v14 = vmul.f32 %v65_v13, %v62_v11  ;;  %v105_v32 = vxor.u32 2147483648, %v104_v30  ;;  %v115_v37 = vxor.u32 2147483648, %v114_v35  ;;  %v124_v40 = vld [vmem:[#allocation2 + $0x7] ss:$0 sm:$0xff] }
  0xab   :  { %v125_v42 = vxor.u32 2147483648, %v124_v40 }
  0xac   :  { %70 = vadd.xlane.f32.xlu0 %v69_v14 }
 0x135   :  { %v71_v16 = vpop.xlane.xlu0 %70 }
 0x136   :  { %v72_v18 = vsel %vm68_vm6, %v71_v16, %v62_v11 }
 0x137   :  { %v79_v19 = vmul.f32 %v75_v17, %v72_v18 }
 0x139   :  { %80 = vadd.xlane.f32.xlu1 %v79_v19 }
 0x1c2   :  { %v81_v21 = vpop.xlane.xlu1 %80 }
 0x1c3   :  { %v82_v23 = vsel %vm78_vm7, %v81_v21, %v72_v18 }
 0x1c4   :  { %v89_v24 = vmul.f32 %v85_v22, %v82_v23 }
 0x1c6   :  { %90 = vadd.xlane.f32.xlu1 %v89_v24 }
 0x24f   :  { %v91_v26 = vpop.xlane.xlu1 %90 }
 0x250   :  { %v92_v28 = vsel %vm88_vm8, %v91_v26, %v82_v23 }
 0x251   :  { %v99_v29 = vmul.f32 %v95_v27, %v92_v28 }
 0x253   :  { %100 = vadd.xlane.f32.xlu0 %v99_v29 }
 0x2dc   :  { %v101_v31 = vpop.xlane.xlu0 %100 }
 0x2dd   :  { %v102_v33 = vsel %vm98_vm9, %v101_v31, %v92_v28 }
 0x2de   :  { %v109_v34 = vmul.f32 %v105_v32, %v102_v33 }
 0x2e0   :  { %110 = vadd.xlane.f32.xlu1 %v109_v34 }
 0x369   :  { %v111_v36 = vpop.xlane.xlu1 %110 }
 0x36a   :  { %v112_v38 = vsel %vm108_vm10, %v111_v36, %v102_v33 }
 0x36b   :  { %v119_v39 = vmul.f32 %v115_v37, %v112_v38 }
 0x36d   :  { %120 = vadd.xlane.f32.xlu0 %v119_v39 }
 0x3f6   :  { %v121_v41 = vpop.xlane.xlu0 %120 }
 0x3f7   :  { %v122_v43 = vsel %vm118_vm11, %v121_v41, %v112_v38 }
 0x3f8   :  { %v129_v44 = vmul.f32 %v125_v42, %v122_v43 }
 0x3fa   :  { %130 = vadd.xlane.f32.xlu1 %v129_v44 }
 0x483   :  { %v131_v45 = vpop.xlane.xlu1 %130 }
 0x484   :  { %v132_v46 = vsel %vm128_vm12, %v131_v45, %v122_v43 }
 0x485   :  { %v134_v47 = vmul.f32 %v181_v7, %v132_v46 }
 0x487   :  { %v136_v48 = vsel %vm135_vm13, %v132_v46, %v134_v47 }
 0x488   :  { %167 = vst [vmem:[%s218_s1] sm:$0xff] %v136_v48 }

// kernel: custom-call.68
= control target key start
LH: loop header
LB: loop body
LE: loop exit
PB: predicated region body
PF: predicated region fallthrough
CT: control target
= control target key end

     0   :  { %v35_v0 = vlaneseq  ;;  %v181_v9 = vmov -1.0   ;;  %s216_s0 = inlined_call_operand.vmem [shape: f32[1,8,8], index: 0, kind: input, shape index: {}]   ;;  %s217_s1 = inlined_call_operand.vmem [shape: f32[1,8,8], index: 1, kind: output, shape index: {}]  }
   0x1   :  { %v30_v1 = vld [vmem:[%s216_s0] sm:$0xff] }
   0x2   :  { %v195_v2 = vand.u32 127, %v35_v0  ;;  %v39_v3 = vshrl.u32 %v35_v0, 7 }
   0x4   :  { %vm37_vm0 = vcmp.lt.s32.totalorder %v195_v2, 8  ;;  %vm41_vm1 = vcmp.eq.s32.totalorder %v39_v3, %v195_v2  ;;  %vm46_vm2 = vcmp.le.s32.totalorder %v39_v3, %v195_v2  ;;  %vm60_vm4 = vcmp.eq.s32.totalorder %v195_v2, 7 }
   0x5   :  { %v43_v4 = vsel %vm41_vm1, %v30_v1, 0.0  ;;  %vm47_vm3 = vmand %vm46_vm2, %vm37_vm0  ;;  %vm57_vm5 = vcmp.eq.s32.totalorder %v195_v2, %v39_v3  ;;  %v61_v10 = vsel %vm60_vm4, 1.0, %v181_v9  ;;  %vm68_vm6 = vcmp.eq.s32.totalorder %v195_v2, 6 }
   0x6   :  { %v48_v5 = vsel %vm47_vm3, %v30_v1, 0.0  ;;  %44 = vadd.xlane.f32.xlu0 %v43_v4  ;;  %v62_v11 = vsel %vm57_vm5, %v61_v10, 0.0  ;;  %vm78_vm7 = vcmp.eq.s32.totalorder %v195_v2, 5  ;;  %vm88_vm8 = vcmp.eq.s32.totalorder %v195_v2, 4 }
   0x7   :  { %vm98_vm9 = vcmp.eq.s32.totalorder %v195_v2, 3  ;;  %vm108_vm10 = vcmp.eq.s32.totalorder %v195_v2, 2  ;;  %vm118_vm11 = vcmp.eq.s32.totalorder %v195_v2, 1  ;;  %vm127_vm12 = vcmp.eq.s32.totalorder %v195_v2, 0 }
  0x8f   :  { %v200_v6 = vpop.xlane.xlu0 %44 }
  0x90   :  { %179 = vrcp.f32 %v200_v6  ;;  %vm134_vm13 = vweird.f32 %v200_v6 }
  0x9d   :  { %v180_v7 = vpop.eup %179 }
  0x9e   :  { %v50_v8 = vmul.f32 %v180_v7, %v48_v5 }
  0xa0   :  { %51 = vst [vmem:[#allocation2] sm:$0xff] %v50_v8 }
  0xa7   :  { %v64_v12 = vld [vmem:[#allocation2 + $0x6] ss:$0 sm:$0xff]  ;;  %v74_v15 = vld [vmem:[#allocation2 + $0x5] ss:$0 sm:$0xff]  ;;  %v84_v20 = vld [vmem:[#allocation2 + $0x4] ss:$0 sm:$0xff] }
  0xa8   :  { %v65_v13 = vxor.u32 2147483648, %v64_v12  ;;  %v75_v17 = vxor.u32 2147483648, %v74_v15  ;;  %v85_v22 = vxor.u32 2147483648, %v84_v20  ;;  %v94_v25 = vld [vmem:[#allocation2 + $0x3] ss:$0 sm:$0xff] }
  0xa9   :  { %v95_v27 = vxor.u32 2147483648, %v94_v25  ;;  %v104_v30 = vld [vmem:[#allocation2 + $0x2] ss:$0 sm:$0xff]  ;;  %v114_v35 = vld [vmem:[#allocation2 + $0x1] ss:$0 sm:$0xff] }
  0xaa   :  { %v69_v14 = vmul.f32 %v65_v13, %v62_v11  ;;  %v105_v32 = vxor.u32 2147483648, %v104_v30  ;;  %v115_v37 = vxor.u32 2147483648, %v114_v35  ;;  %v123_v40 = vld [vmem:[#allocation2] ss:$0 sm:$0xff] }
  0xab   :  { %v124_v42 = vxor.u32 2147483648, %v123_v40 }
  0xac   :  { %70 = vadd.xlane.f32.xlu0 %v69_v14 }
 0x135   :  { %v71_v16 = vpop.xlane.xlu0 %70 }
 0x136   :  { %v72_v18 = vsel %vm68_vm6, %v71_v16, %v62_v11 }
 0x137   :  { %v79_v19 = vmul.f32 %v75_v17, %v72_v18 }
 0x139   :  { %80 = vadd.xlane.f32.xlu1 %v79_v19 }
 0x1c2   :  { %v81_v21 = vpop.xlane.xlu1 %80 }
 0x1c3   :  { %v82_v23 = vsel %vm78_vm7, %v81_v21, %v72_v18 }
 0x1c4   :  { %v89_v24 = vmul.f32 %v85_v22, %v82_v23 }
 0x1c6   :  { %90 = vadd.xlane.f32.xlu1 %v89_v24 }
 0x24f   :  { %v91_v26 = vpop.xlane.xlu1 %90 }
 0x250   :  { %v92_v28 = vsel %vm88_vm8, %v91_v26, %v82_v23 }
 0x251   :  { %v99_v29 = vmul.f32 %v95_v27, %v92_v28 }
 0x253   :  { %100 = vadd.xlane.f32.xlu0 %v99_v29 }
 0x2dc   :  { %v101_v31 = vpop.xlane.xlu0 %100 }
 0x2dd   :  { %v102_v33 = vsel %vm98_vm9, %v101_v31, %v92_v28 }
 0x2de   :  { %v109_v34 = vmul.f32 %v105_v32, %v102_v33 }
 0x2e0   :  { %110 = vadd.xlane.f32.xlu1 %v109_v34 }
 0x369   :  { %v111_v36 = vpop.xlane.xlu1 %110 }
 0x36a   :  { %v112_v38 = vsel %vm108_vm10, %v111_v36, %v102_v33 }
 0x36b   :  { %v119_v39 = vmul.f32 %v115_v37, %v112_v38 }
 0x36d   :  { %120 = vadd.xlane.f32.xlu0 %v119_v39 }
 0x3f6   :  { %v121_v41 = vpop.xlane.xlu0 %120 }
 0x3f7   :  { %v122_v43 = vsel %vm118_vm11, %v121_v41, %v112_v38 }
 0x3f8   :  { %v128_v44 = vmul.f32 %v124_v42, %v122_v43 }
 0x3fa   :  { %129 = vadd.xlane.f32.xlu1 %v128_v44 }
 0x483   :  { %v130_v45 = vpop.xlane.xlu1 %129 }
 0x484   :  { %v131_v46 = vsel %vm127_vm12, %v130_v45, %v122_v43 }
 0x485   :  { %v133_v47 = vmul.f32 %v180_v7, %v131_v46 }
 0x487   :  { %v135_v48 = vsel %vm134_vm13, %v131_v46, %v133_v47 }
 0x488   :  { %166 = vst [vmem:[%s217_s1] sm:$0xff] %v135_v48 }

// kernel: neg.33
= control target key start
LH: loop header
LB: loop body
LE: loop exit
PB: predicated region body
PF: predicated region fallthrough
CT: control target
= control target key end

     0   :  { %s24_s0 = inlined_call_operand.vmem [shape: f32[8], index: 0, kind: input, shape index: {}]   ;;  %s25_s1 = inlined_call_operand.vmem [shape: f32[8], index: 1, kind: output, shape index: {}]  }
   0x1   :  { %v2_v0 = vld [vmem:[%s24_s0] sm:$0x1] }
   0x2   :  { %v5_v1 = vxor.u32 2147483648, %v2_v0 }
   0x4   :  { %7 = vst [vmem:[%s25_s1] sm:$0x1] %v5_v1 }

// kernel: _dmegp_forward.1
= control target key start
LH: loop header
LB: loop body
LE: loop exit
PB: predicated region body
PF: predicated region fallthrough
CT: control target
= control target key end

     0   :  { %s1351_s0 = inlined_call_operand.vmem [shape: f32[1,4], index: 0, kind: input, shape index: {}]   ;;  %s1352_s1 = inlined_call_operand.vmem [shape: f32[1,1,4], index: 1, kind: input, shape index: {}]   ;;  %s1353_s2 = inlined_call_operand.vmem [shape: f32[1,8,4], index: 2, kind: input, shape index: {}]   ;;  %s1354_s3 = inlined_call_operand.vmem [shape: f32[1,8,4], index: 3, kind: input, shape index: {}]   ;;  %s1355_s4 = inlined_call_operand.vmem [shape: f32[1,1,8], index: 4, kind: input, shape index: {}]   ;;  %s1356_s5 = inlined_call_operand.vmem [shape: f32[1,2,8], index: 5, kind: output, shape index: {0}]   ;;  %s1357_s6 = inlined_call_operand.hbm [shape: f32[1,1,1], index: 6, kind: output, shape index: {1}]  }
   0x1   :  { %s12_s23 = sshll.u32 %s1351_s0, 4  ;;  %s13_s23 = int_to_ptr.vmem [resolvable:$true] %s12_s23 }
   0x2   :  { %s1087_s24 = scalar_lea.vmem %s13_s23, 16  ;;  %p1092_p1 = scmp.lt.s32.totalorder %s13_s23, %s13_s23 }
   0x3   :  { %p1088_p0 = scmp.ne.s32.totalorder %s13_s23, %s1087_s24  ;;  %p1093_p2 = scmp.lt.s32.totalorder %s1087_s24, %s1087_s24 }
   0x5   :  { %p1094_p3 = por %p1093_p2, %p1092_p1 }
   0x7   :  { %p1095_p4 = pnand %p1094_p3, %p1088_p0 }
   0x9   :  { %1098 = shalt.err (!%p1095_p4)  }
   0xa   :  { %s1123_s25 = smov [#allocation3]  }
   0xb   :  { %15 = dma.vmem_to_smem %s13_s23, 16, %s1123_s25, [#allocation2] }
   0xc   :  { %1119 = dma.done.wait [#allocation2], 16 }
   0xd   :  { %1120 = vsyncadd [#allocation2], 4294967280 }
   0xe   :  { %17 = sfence }
   0xf   :  { %v954_v0 = vld [vmem:[%s1352_s1] ss:$0 sm:$0xff]  ;;  %v1124_v1 = vmov 0.0  }
  0x10   :  { %981 = vmatprep.subr.mxu0 %v1124_v1  ;;  %986 = vmatprep.subr.mxu1 %v1124_v1  ;;  %1049 = vrcp.f32 %v954_v0 }
  0x11   :  { %18 = vsyncpa [#allocation5], 0  ;;  %vm1125_vm0 = vmmov 0   ;;  %v34_v2 = vld [vmem:[%s1353_s2] sm:$0xff]  ;;  %vm48_vm1 = vcmask 31744   ;;  %v1126_v10 = vmov 1.0   ;;  %v347_v12 = vlaneseq }
  0x12   :  { %983 = vmatprep.mubr.msk.f32.mxu0 %vm1125_vm0, %v1124_v1  ;;  %988 = vmatprep.mubr.msk.f32.mxu1 %vm1125_vm0, %v1124_v1  ;;  %v43_v3 = vld [vmem:[%s1354_s3] sm:$0xff]  ;;  %v1127_v11 = vmov 0   ;;  %s1221_s2 = sld [smem:[#allocation3 + $0x1]]  ;;  %v1128_v51 = vmov 1   ;;  %v1129_v63 = vmov 2   ;;  %s1135_s8 = smov 126  }
  0x13   :  { %1036 = vset.pattern.permute.xlu0 %v1127_v11  ;;  %v1218_v13 = vshrl.u32 %v347_v12, 7  ;;  %s953_s3 = sld [smem:[#allocation3 + $0x2]]  ;;  %v1223_v38 = vand.u32 127, %v347_v12  ;;  %1037 = vset.pattern.permute.xlu1 %v1128_v51  ;;  %s1136_s9 = smov 125   ;;  %vm689_vm11 = vcmask 64512   ;;  %vm922_vm12 = vcmask 57344  }
  0x14   :  { %s1225_s30 = sld [smem:[#allocation3]]  ;;  %s1137_s10 = smov 124   ;;  %vm932_vm13 = vcmask 0  }
  0x15   :  { %v349_v14 = vsub.s32 0, %v1218_v13  ;;  %vm367_vm2 = vcmp.eq.s32.totalorder %v1218_v13, %v1223_v38  ;;  %vm394_vm3 = vcmp.eq.s32.totalorder %v1223_v38, 0  ;;  %v430_v58 = vsub.s32 1, %v1218_v13  ;;  %s1138_s11 = smov 123   ;;  %s1139_s12 = smov 122  }
  0x16   :  { %v963_v39 = vsel %vm367_vm2, 1.0, %v1124_v1  ;;  %vm434_vm4 = vcmp.eq.s32.totalorder %v1223_v38, 1  ;;  %vm474_vm5 = vcmp.eq.s32.totalorder %v1223_v38, 2  ;;  %vm514_vm6 = vcmp.eq.s32.totalorder %v1223_v38, 3  ;;  %s1140_s13 = smov 121   ;;  %s1141_s14 = smov 127  }
  0x17   :  { %vm554_vm7 = vcmp.eq.s32.totalorder %v1223_v38, 4  ;;  %vm594_vm8 = vcmp.eq.s32.totalorder %v1223_v38, 5  ;;  %vm634_vm9 = vcmp.eq.s32.totalorder %v1223_v38, 6  ;;  %vm673_vm10 = vcmp.eq.s32.totalorder %v1223_v38, 7  ;;  %s1142_s19 = smov [#allocation4]  }
  0x18   :  { %s942_s20 = sshll.u32 %s1142_s19, 4  ;;  %s943_s20 = int_to_ptr.vmem [resolvable:$true] %s942_s20 }
  0x19   :  { %s375_s7 = sadd.f32 %s953_s3, %s1221_s2  ;;  %s1099_s21 = scalar_lea.vmem %s943_s20, 16 }
  0x1a   :  { %v373_v41 = vstv %s1225_s30  ;;  %p1100_p5 = scmp.ne.s32.totalorder %s943_s20, %s1099_s21  ;;  %s1103_s22 = scalar_lea.vmem %s943_s20, 32 }
  0x1b   :  { %v376_v40 = vstv %s375_s7  ;;  %p1104_p6 = scmp.lt.s32.totalorder %s943_s20, %s943_s20  ;;  %p1105_p7 = scmp.lt.s32.totalorder %s1103_s22, %s1099_s21 }
  0x1c   :  { %v377_v42 = vmul.f32 %v963_v39, %v376_v40 }
  0x1d   :  { %v1050_v4 = vpop.eup %1049  ;;  %p1106_p8 = por %p1105_p7, %p1104_p6 }
  0x1e   :  { %v42_v5 = vmul.f32 %v1050_v4, %v34_v2  ;;  %v44_v6 = vmul.f32 %v1050_v4, %v43_v3 }
  0x1f   :  { %p1107_p9 = pnand %p1106_p8, %p1100_p5 }
  0x20   :  { %v46_v7 = vmul.f32 %v42_v5, %v42_v5  ;;  %v47_v8 = vmul.f32 %v44_v6, %v44_v6 }
  0x22   :  { %982 = vmatpush3.xpose.msk.msra.mxu0 %vm48_vm1, %v46_v7  ;;  %987 = vmatpush3.xpose.msk.msra.mxu1 %vm48_vm1, %v47_v8  ;;  %v49_v9 = vsel %vm48_vm1, %v46_v7, 0.0 }
  0x23   :  { %991 = vmatprep.subr.mxu0 %v1124_v1  ;;  %996 = vmatprep.subr.mxu1 %v1124_v1 }
  0x24   :  { %50 = vadd.xlane.f32.xlu0 %v49_v9  ;;  %v470_v9 = vsub.s32 2, %v1218_v13 }
  0x25   :  { %984 = vmatmul.mubr.msk.f32.vlgmr.msra.gmra.mxu0 %vm48_vm1, %v1126_v10  ;;  %989 = vmatmul.mubr.msk.f32.vlgmr.msra.gmra.mxu1 %vm48_vm1, %v1126_v10 }
  0x26   :  { %992 = vmatpush3.xpose.msk.msra.mxu0 %vm48_vm1, %v42_v5  ;;  %997 = vmatpush3.xpose.msk.msra.mxu1 %vm48_vm1, %v44_v6 }
  0x27   :  { %993 = vmatprep.mubr.msk.f32.mxu0 %vm1125_vm0, %v1124_v1  ;;  %998 = vmatprep.mubr.msk.f32.mxu1 %vm1125_vm0, %v1124_v1 }
  0x28   :  { %1006 = vmatprep.subr.mxu1 %v1124_v1  ;;  %1001 = vmatprep.subr.mxu0 %v1124_v1 }
  0x29   :  { %994 = vmatmul.mubr.msk.f32.vlgmr.msra.gmra.mxu0 %vm48_vm1, %v42_v5  ;;  %999 = vmatmul.mubr.msk.f32.vlgmr.msra.gmra.mxu1 %vm48_vm1, %v42_v5 }
  0x2a   :  { %1003 = vmatprep.mubr.msk.f32.mxu0 %vm1125_vm0, %v1124_v1  ;;  %1008 = vmatprep.mubr.msk.f32.mxu1 %vm1125_vm0, %v1124_v1 }
  0xad   :  { %v51_v19 = vpop.xlane.xlu0 %50 }
  0xe5   :  { %v124_v15 = vpop.f32.mrf.mxu0  ;;  %v197_v16 = vpop.f32.mrf.mxu1 }
  0xe6   :  { %v350_v17 = vrot.slane %v124_v15, %v349_v14  ;;  %v358_v18 = vrot.slane %v197_v16, %v349_v14 }
  0xe7   :  { %v985_v20 = vpop.f32.mrf.mxu0  ;;  %v990_v21 = vpop.f32.mrf.mxu1 }
  0xe8   :  { %v359_v22 = vadd.f32 %v358_v18, %v51_v19  ;;  %v351_v25 = vadd.f32 %v350_v17, %v51_v19 }
  0xe9   :  { %v270_v23 = vpop.f32.mrf.mxu0  ;;  %v343_v24 = vpop.f32.mrf.mxu1 }
  0xea   :  { %v352_v26 = vmul.f32 2.0, %v270_v23  ;;  %v360_v27 = vmul.f32 2.0, %v343_v24 }
  0xeb   :  { %v995_v28 = vpop.f32.mrf.mxu0  ;;  %v1000_v29 = vpop.f32.mrf.mxu1 }
  0xec   :  { %v353_v30 = vsub.f32 %v351_v25, %v352_v26  ;;  %v361_v31 = vsub.f32 %v359_v22, %v360_v27  ;;  %v1130_v28 = vmov 3   ;;  %v510_v29 = vsub.s32 3, %v1218_v13 }
  0xee   :  { %v354_v32 = vmax.f32 %v353_v30, 0.0  ;;  %v362_v33 = vmax.f32 %v361_v31, 0.0 }
  0xf0   :  { %v370_v34 = vmul.f32 -0.5, %v354_v32  ;;  %v379_v35 = vmul.f32 -0.5, %v362_v33 }
  0xf2   :  { %v371_v36 = vmul.f32 1.442695, %v370_v34  ;;  %v380_v37 = vmul.f32 1.442695, %v379_v35 }
  0xf4   :  { %1051 = vpow2.f32 %v371_v36 }
  0xf5   :  { %1053 = vpow2.f32 %v380_v37 }
 0x101   :  { %v1052_v43 = vpop.eup %1051 }
 0x102   :  { %v1054_v44 = vpop.eup %1053  ;;  %v374_v45 = vmul.f32 %v1052_v43, %v373_v41  ;;  %v1131_v43 = vmov 4  }
 0x103   :  { %v1232_v46 = vmul.f32 %v1054_v44, %v373_v41 }
 0x104   :  { %v1234_v47 = vadd.f32 %v377_v42, %v374_v45 }
 0x105   :  { %1007 = vmatpush3.msra.mxu1 %v1232_v46 }
 0x106   :  { %1055 = vrcp.f32 %v1234_v47  ;;  %v395_v52 = vsel %vm394_vm3, 0.0, %v1234_v47 }
 0x107   :  { %v409_v53 = vrot.slane %v395_v52, %v349_v14 }
 0x113   :  { %v1056_v48 = vpop.eup %1055 }
 0x114   :  { %v391_v49 = vrot.slane %v1056_v48, %v349_v14  ;;  %v550_v48 = vsub.s32 4, %v1218_v13 }
 0x116   :  { %v392_v50 = vmul.f32 %v391_v49, %v1234_v47  ;;  %v393_v62 = vmul.f32 %v963_v39, %v391_v49 }
 0x118   :  { %398 = vperm.xlu0 %1036, %v392_v50  }
 0x193   :  { %v399_v54 = vpop.permute.xlu0 %398 }
 0x194   :  { %v410_v55 = vmul.f32 %v409_v53, %v399_v54 }
 0x196   :  { %v412_v56 = vsub.f32 %v1234_v47, %v410_v55 }
 0x198   :  { %v1246_v57 = vsel %vm394_vm3, %v399_v54, %v412_v56 }
 0x199   :  { %1057 = vrcp.f32 %v1246_v57  ;;  %v435_v0 = vsel %vm434_vm4, 0.0, %v1246_v57 }
 0x19a   :  { %v449_v2 = vrot.slane %v435_v0, %v430_v58 }
 0x1a6   :  { %v1058_v59 = vpop.eup %1057 }
 0x1a7   :  { %v431_v60 = vrot.slane %v1058_v59, %v430_v58  ;;  %v1132_v58 = vmov 5  }
 0x1a9   :  { %v432_v61 = vmul.f32 %v431_v60, %v1246_v57 }
 0x1ab   :  { %438 = vperm.xlu1 %1037, %v432_v61  }
 0x1af   :  { %1038 = vset.pattern.permute.xlu1 %v1127_v11 }
 0x1b0   :  { %403 = vperm.xlu1 %1038, %v393_v62  }
 0x1b4   :  { %1039 = vset.pattern.permute.xlu1 %v1129_v63 }
 0x226   :  { %v439_v3 = vpop.permute.xlu1 %438 }
 0x227   :  { %v450_v4 = vmul.f32 %v449_v2, %v439_v3 }
 0x229   :  { %v452_v5 = vsub.f32 %v1246_v57, %v450_v4 }
 0x22b   :  { %v1259_v6 = vsel %vm434_vm4, %v439_v3, %v452_v5  ;;  %v404_v7 = vpop.permute.xlu1 %403 }
 0x22c   :  { %1059 = vrcp.f32 %v1259_v6  ;;  %v411_v8 = vmul.f32 %v409_v53, %v404_v7  ;;  %v475_v17 = vsel %vm474_vm5, 0.0, %v1259_v6 }
 0x22d   :  { %v489_v18 = vrot.slane %v475_v17, %v470_v9 }
 0x22e   :  { %v413_v11 = vsub.f32 %v963_v39, %v411_v8 }
 0x230   :  { %v417_v15 = vsel %vm394_vm3, %v404_v7, %v413_v11  ;;  %v1133_v7 = vmov 6  }
 0x231   :  { %v433_v16 = vmul.f32 %v431_v60, %v417_v15  ;;  %1046 = vset.pattern.permute.xlu0 %v1133_v7 }
 0x239   :  { %v1060_v10 = vpop.eup %1059 }
 0x23a   :  { %v471_v12 = vrot.slane %v1060_v10, %v470_v9 }
 0x23c   :  { %v472_v14 = vmul.f32 %v471_v12, %v1259_v6 }
 0x23e   :  { %478 = vperm.xlu1 %1039, %v472_v14  }
 0x242   :  { %1040 = vset.pattern.permute.xlu1 %v1128_v51 }
 0x243   :  { %443 = vperm.xlu1 %1040, %v433_v16  }
 0x247   :  { %1041 = vset.pattern.permute.xlu1 %v1129_v63 }
 0x2b9   :  { %v479_v19 = vpop.permute.xlu1 %478 }
 0x2ba   :  { %v490_v20 = vmul.f32 %v489_v18, %v479_v19 }
 0x2bc   :  { %v492_v21 = vsub.f32 %v1259_v6, %v490_v20  ;;  %v630_v20 = vsub.s32 6, %v1218_v13 }
 0x2be   :  { %v1273_v22 = vsel %vm474_vm5, %v479_v19, %v492_v21  ;;  %v444_v23 = vpop.permute.xlu1 %443 }
 0x2bf   :  { %1061 = vrcp.f32 %v1273_v22  ;;  %v451_v24 = vmul.f32 %v449_v2, %v444_v23  ;;  %v515_v39 = vsel %vm514_vm6, 0.0, %v1273_v22  ;;  %v590_v2 = vsub.s32 5, %v1218_v13 }
 0x2c0   :  { %v529_v40 = vrot.slane %v515_v39, %v510_v29 }
 0x2c1   :  { %v453_v25 = vsub.f32 %v417_v15, %v451_v24 }
 0x2c3   :  { %v457_v26 = vsel %vm434_vm4, %v444_v23, %v453_v25 }
 0x2c4   :  { %v473_v27 = vmul.f32 %v471_v12, %v457_v26 }
 0x2c6   :  { %483 = vperm.xlu1 %1041, %v473_v27  }
 0x2ca   :  { %1042 = vset.pattern.permute.xlu1 %v1130_v28 }
 0x2cc   :  { %v1062_v30 = vpop.eup %1061 }
 0x2cd   :  { %v511_v31 = vrot.slane %v1062_v30, %v510_v29 }
 0x2cf   :  { %v512_v32 = vmul.f32 %v511_v31, %v1273_v22 }
 0x2d1   :  { %518 = vperm.xlu1 %1042, %v512_v32  }
 0x341   :  { %v484_v33 = vpop.permute.xlu1 %483 }
 0x342   :  { %v491_v34 = vmul.f32 %v489_v18, %v484_v33 }
 0x344   :  { %v493_v35 = vsub.f32 %v457_v26, %v491_v34 }
 0x346   :  { %v497_v36 = vsel %vm474_vm5, %v484_v33, %v493_v35  ;;  %v1134_v35 = vmov 7  }
 0x347   :  { %v513_v37 = vmul.f32 %v511_v31, %v497_v36 }
 0x349   :  { %523 = vperm.xlu1 %1042, %v513_v37  }
 0x34c   :  { %v519_v41 = vpop.permute.xlu1 %518 }
 0x34d   :  { %v530_v42 = vmul.f32 %v529_v40, %v519_v41  ;;  %1043 = vset.pattern.permute.xlu1 %v1131_v43 }
 0x34f   :  { %v532_v44 = vsub.f32 %v1273_v22, %v530_v42 }
 0x351   :  { %v536_v45 = vsel %vm514_vm6, %v519_v41, %v532_v44 }
 0x352   :  { %1063 = vrcp.f32 %v536_v45  ;;  %v555_v59 = vsel %vm554_vm7, 0.0, %v536_v45 }
 0x353   :  { %v569_v60 = vrot.slane %v555_v59, %v550_v48 }
 0x35f   :  { %v1064_v49 = vpop.eup %1063 }
 0x360   :  { %v551_v50 = vrot.slane %v1064_v49, %v550_v48 }
 0x362   :  { %v552_v51 = vmul.f32 %v551_v50, %v536_v45 }
 0x364   :  { %558 = vperm.xlu1 %1043, %v552_v51  }
 0x3c4   :  { %v524_v52 = vpop.permute.xlu1 %523 }
 0x3c5   :  { %v531_v53 = vmul.f32 %v529_v40, %v524_v52 }
 0x3c7   :  { %v533_v54 = vsub.f32 %v497_v36, %v531_v53 }
 0x3c9   :  { %v537_v55 = vsel %vm514_vm6, %v524_v52, %v533_v54  ;;  %v670_v52 = vsub.s32 7, %v1218_v13 }
 0x3ca   :  { %v553_v56 = vmul.f32 %v551_v50, %v537_v55 }
 0x3cc   :  { %563 = vperm.xlu1 %1043, %v553_v56  }
 0x3d0   :  { %1044 = vset.pattern.permute.xlu1 %v1132_v58 }
 0x3df   :  { %v559_v61 = vpop.permute.xlu1 %558 }
 0x3e0   :  { %v570_v62 = vmul.f32 %v569_v60, %v559_v61 }
 0x3e2   :  { %v572_v63 = vsub.f32 %v536_v45, %v570_v62 }
 0x3e4   :  { %v576_v0 = vsel %vm554_vm7, %v559_v61, %v572_v63 }
 0x3e5   :  { %1065 = vrcp.f32 %v576_v0  ;;  %v595_v14 = vsel %vm594_vm8, 0.0, %v576_v0 }
 0x3e6   :  { %v609_v15 = vrot.slane %v595_v14, %v590_v2 }
 0x3f2   :  { %v1066_v3 = vpop.eup %1065 }
 0x3f3   :  { %v591_v4 = vrot.slane %v1066_v3, %v590_v2 }
 0x3f5   :  { %v592_v5 = vmul.f32 %v591_v4, %v576_v0 }
 0x3f7   :  { %598 = vperm.xlu1 %1044, %v592_v5  }
 0x447   :  { %v564_v8 = vpop.permute.xlu1 %563 }
 0x448   :  { %v571_v9 = vmul.f32 %v569_v60, %v564_v8 }
 0x44a   :  { %v573_v10 = vsub.f32 %v537_v55, %v571_v9 }
 0x44c   :  { %v577_v11 = vsel %vm554_vm7, %v564_v8, %v573_v10 }
 0x44d   :  { %v593_v12 = vmul.f32 %v591_v4, %v577_v11 }
 0x44f   :  { %603 = vperm.xlu1 %1044, %v593_v12  }
 0x453   :  { %1045 = vset.pattern.permute.xlu1 %v1133_v7 }
 0x472   :  { %v599_v16 = vpop.permute.xlu1 %598 }
 0x473   :  { %v610_v17 = vmul.f32 %v609_v15, %v599_v16 }
 0x475   :  { %v612_v18 = vsub.f32 %v576_v0, %v610_v17 }
 0x477   :  { %v616_v19 = vsel %vm594_vm8, %v599_v16, %v612_v18 }
 0x478   :  { %1067 = vrcp.f32 %v616_v19 }
 0x479   :  { %1069 = vlog2.f32 %v1259_v6 }
 0x47a   :  { %1071 = vlog2.f32 %v1273_v22 }
 0x47b   :  { %1073 = vlog2.f32 %v536_v45  ;;  %v635_v45 = vsel %vm634_vm9, 0.0, %v616_v19 }
 0x47c   :  { %1075 = vlog2.f32 %v576_v0  ;;  %v649_v48 = vrot.slane %v635_v45, %v630_v20 }
 0x47d   :  { %1077 = vlog2.f32 %v616_v19 }
 0x485   :  { %v1068_v21 = vpop.eup %1067 }
 0x486   :  { %v631_v23 = vrot.slane %v1068_v21, %v630_v20  ;;  %v1070_v27 = vpop.eup %1069 }
 0x487   :  { %v459_v31 = vmul.f32 0.6931472, %v1070_v27  ;;  %v1072_v32 = vpop.eup %1071 }
 0x488   :  { %v632_v24 = vmul.f32 %v631_v23, %v616_v19  ;;  %v499_v34 = vmul.f32 0.6931472, %v1072_v32  ;;  %v1074_v6 = vpop.eup %1073 }
 0x489   :  { %v461_v33 = vrot.slane %v459_v31, 2  ;;  %v539_v36 = vmul.f32 0.6931472, %v1074_v6  ;;  %v1076_v37 = vpop.eup %1075 }
 0x48a   :  { %638 = vperm.xlu1 %1045, %v632_v24   ;;  %v501_v22 = vrot.slane %v499_v34, 3  ;;  %v579_v40 = vmul.f32 0.6931472, %v1076_v37  ;;  %v1078_v41 = vpop.eup %1077 }
 0x48b   :  { %v541_v39 = vrot.slane %v539_v36, 4  ;;  %v619_v43 = vmul.f32 0.6931472, %v1078_v41 }
 0x48c   :  { %v581_v42 = vrot.slane %v579_v40, 5 }
 0x48d   :  { %v621_v44 = vrot.slane %v619_v43, 6 }
 0x48e   :  { %1047 = vset.pattern.permute.xlu1 %v1134_v35 }
 0x4ca   :  { %v604_v25 = vpop.permute.xlu1 %603 }
 0x4cb   :  { %v611_v26 = vmul.f32 %v609_v15, %v604_v25 }
 0x4cd   :  { %v613_v28 = vsub.f32 %v577_v11, %v611_v26 }
 0x4cf   :  { %v617_v29 = vsel %vm594_vm8, %v604_v25, %v613_v28 }
 0x4d0   :  { %v633_v30 = vmul.f32 %v631_v23, %v617_v29 }
 0x4d2   :  { %643 = vperm.xlu0 %1046, %v633_v30  }
 0x4d6   :  { %462 = vrot.lane.b32.xlu0 %v461_v33, %s1135_s8 }
 0x4d7   :  { %1048 = vset.pattern.permute.xlu0 %v1134_v35 }
 0x4da   :  { %502 = vrot.lane.b32.xlu0 %v501_v22, %s1136_s9 }
 0x4de   :  { %542 = vrot.lane.b32.xlu0 %v541_v39, %s1137_s10 }
 0x4e2   :  { %582 = vrot.lane.b32.xlu0 %v581_v42, %s1138_s11 }
 0x4e6   :  { %622 = vrot.lane.b32.xlu0 %v621_v44, %s1139_s12 }
 0x505   :  { %v639_v49 = vpop.permute.xlu1 %638 }
 0x506   :  { %v650_v50 = vmul.f32 %v649_v48, %v639_v49 }
 0x508   :  { %v652_v51 = vsub.f32 %v616_v19, %v650_v50 }
 0x50a   :  { %v656_v53 = vsel %vm634_vm9, %v639_v49, %v652_v51 }
 0x50b   :  { %1079 = vlog2.f32 %v656_v53  ;;  %v674_v54 = vsel %vm673_vm10, 0.0, %v656_v53 }
 0x50c   :  { %v683_v55 = vrot.slane %v674_v54, %v670_v52  ;;  %1081 = vrcp.f32 %v656_v53 }
 0x50d   :  { %1083 = vlog2.f32 %v1246_v57  ;;  %v45_v57 = vld [vmem:[%s1355_s4] sm:$0x1]  ;;  %s917_s4 = sadd.f32 %s1221_s2, %s1225_s30 }
 0x50e   :  { %1085 = vlog2.f32 %v1234_v47 }
 0x50f   :  { %v918_v24 = vstv %s917_s4 }
 0x518   :  { %v1080_v56 = vpop.eup %1079 }
 0x519   :  { %v659_v58 = vmul.f32 0.6931472, %v1080_v56  ;;  %v1082_v61 = vpop.eup %1081 }
 0x51a   :  { %v1084_v13 = vpop.eup %1083  ;;  %v671_v0 = vrot.slane %v1082_v61, %v670_v52 }
 0x51b   :  { %v661_v59 = vrot.slane %v659_v58, 7  ;;  %v419_v4 = vmul.f32 0.6931472, %v1084_v13 }
 0x51d   :  { %662 = vrot.lane.b32.xlu0 %v661_v59, %s1140_s13  ;;  %v421_v5 = vrot.slane %v419_v4, 1 }
 0x54d   :  { %v644_v60 = vpop.permute.xlu0 %643 }
 0x54e   :  { %v651_v62 = vmul.f32 %v649_v48, %v644_v60 }
 0x550   :  { %v653_v63 = vsub.f32 %v617_v29, %v651_v62 }
 0x551   :  { %v463_v28 = vpop.permute.xlu0 %462 }
 0x552   :  { %v657_v2 = vsel %vm634_vm9, %v644_v60, %v653_v63 }
 0x553   :  { %v672_v3 = vmul.f32 %v671_v0, %v657_v2 }
 0x555   :  { %677 = vperm.xlu1 %1047, %v672_v3   ;;  %v503_v32 = vpop.permute.xlu0 %502 }
 0x559   :  { %422 = vrot.lane.b32.xlu1 %v421_v5, %s1141_s14  ;;  %v543_v34 = vpop.permute.xlu0 %542 }
 0x55d   :  { %v583_v22 = vpop.permute.xlu0 %582 }
 0x561   :  { %v623_v37 = vpop.permute.xlu0 %622 }
 0x58f   :  { %v663_v40 = vpop.permute.xlu0 %662 }
 0x5d0   :  { %v678_v7 = vpop.permute.xlu1 %677 }
 0x5d1   :  { %v684_v8 = vmul.f32 %v683_v55, %v678_v7 }
 0x5d3   :  { %v685_v9 = vsub.f32 %v657_v2, %v684_v8 }
 0x5d4   :  { %v423_v29 = vpop.permute.xlu1 %422 }
 0x5d5   :  { %v688_v10 = vsel %vm673_vm10, %v678_v7, %v685_v9 }
 0x5d6   :  { %1002 = vmatpush3.msra.mxu0 %v688_v10 }
 0x5d7   :  { %1004 = vmatmul.mubr.msk.f32.vlgmr.msra.gmra.mxu0 %vm689_vm11, %v45_v57  ;;  %1011 = vmatprep.subr.mxu0 %v1124_v1 }
 0x5d8   :  { %1012 = vmatpush3.msra.mxu0 %v1232_v46  ;;  %1013 = vmatprep.mubr.msk.f32.mxu0 %vm1125_vm0, %v1124_v1 }
 0x5db   :  { %1014 = vmatmul.mubr.msk.f32.vlgmr.msra.gmra.mxu0 %vm689_vm11, %v688_v10 }
 0x697   :  { %v759_v11 = vpop.f32.mrf.mxu0 }
 0x698   :  { %v921_v12 = vmul.f32 %v759_v11, %v45_v57  ;;  %1009 = vmatmul.mubr.msk.f32.vlgmr.msra.gmra.mxu1 %vm689_vm11, %v759_v11 }
 0x699   :  { %v1005_v38 = vpop.f32.mrf.mxu0 }
 0x69a   :  { %v923_v14 = vsel %vm922_vm12, %v921_v12, 0.0 }
 0x69b   :  { %v905_v15 = vpop.f32.mrf.mxu0  ;;  %924 = vadd.xlane.f32.xlu1 %v923_v14 }
 0x69c   :  { %v909_v16 = vmul.f32 %v905_v15, %v1232_v46  ;;  %v1086_v46 = vpop.eup %1085 }
 0x69d   :  { %v1015_v17 = vpop.f32.mrf.mxu0  ;;  %v384_v30 = vmul.f32 0.6931472, %v1086_v46 }
 0x69e   :  { %v910_v18 = vsel %vm689_vm11, %v909_v16, 0.0 }
 0x69f   :  { %v911_v1 = vrot.slane %v910_v18, 4  ;;  %v425_v31 = vadd.f32 %v423_v29, %v384_v30 }
 0x6a1   :  { %v912_v19 = vadd.f32 %v911_v1, %v910_v18  ;;  %v465_v33 = vadd.f32 %v463_v28, %v425_v31 }
 0x6a3   :  { %v913_v20 = vrot.slane %v912_v19, 2  ;;  %v505_v35 = vadd.f32 %v503_v32, %v465_v33 }
 0x6a5   :  { %v914_v21 = vadd.f32 %v913_v20, %v912_v19  ;;  %v545_v6 = vadd.f32 %v543_v34, %v505_v35 }
 0x6a7   :  { %v915_v23 = vrot.slane %v914_v21, 1  ;;  %v585_v36 = vadd.f32 %v583_v22, %v545_v6 }
 0x6a9   :  { %v916_v25 = vadd.f32 %v915_v23, %v914_v21  ;;  %v625_v39 = vadd.f32 %v623_v37, %v585_v36 }
 0x6ab   :  { %v919_v26 = vsub.f32 %v918_v24, %v916_v25  ;;  %v665_v41 = vadd.f32 %v663_v40, %v625_v39 }
 0x6ad   :  { %v920_v27 = vmax.f32 %v919_v26, 0.0  ;;  %v927_v44 = vmul.f32 0.5, %v665_v41 }
 0x6af   :  { %931 = vst.msk [vmem:[%s1356_s5 + $0x1] sm:$0x1] %vm922_vm12, %v920_v27 }
 0x724   :  { %v925_v42 = vpop.xlane.xlu1 %924 }
 0x725   :  { %v926_v43 = vmul.f32 0.5, %v925_v42 }
 0x727   :  { %v928_v47 = vadd.f32 %v927_v44, %v926_v43 }
 0x729   :  { %v929_v45 = vadd.f32 7.351508, %v928_v47 }
 0x72b   :  { %933 = vst.msk [vmem:[#allocation4] sm:$0x1] %vm932_vm13, %v929_v45 }
 0x72c   :  { %1110 = shalt.err (!%p1107_p9)
}
 0x72d   :  { %945 = dma.vmem_to_hbm [thread:$0]  %s943_s20, 16, %s1357_s6, [#allocation5]  }
 0x758   :  { %v832_v48 = vpop.f32.mrf.mxu1 }
 0x759   :  { %930 = vst.msk [vmem:[%s1356_s5] sm:$0x1] %vm922_vm12, %v832_v48 }
 0x75a   :  { %v1010_v49 = vpop.f32.mrf.mxu1 }
 0x75b   :  { %1121 = dma.done.wait [#allocation5], 16  }
 0x75c   :  { %1122 = vsyncadd [#allocation5], 4294967280 }
 0x75d   :  { %951 = vsyncpa [#allocation5], 1 }

</bundles_post_ra>
